<compile_context>
chip_gen: v6e
topology: v6e:2x2x1
jax: 0.10.0
libtpu: 0.0.40
codegen_flags: <defaults>
</compile_context>

<pallas_src>
import math

import jax
import jax.numpy as jnp
from jax.experimental import pallas as pl
from jax.experimental.pallas import tpu as pltpu

# HyperParams from the reference module
HIDDEN_SIZE = 512
NUM_LAYERS = 4
NUM_HID = NUM_LAYERS - 1     # hidden 512x512 layers, streamed along the layer grid axis
STATE_DIM = 96               # n_observations
STATE_PAD = 128              # lane-aligned padded input width
N_ACTIONS = 128              # n_actions (synthetic, lane-aligned choice)
LN_EPS = 1e-5                # PyTorch nn.LayerNorm default


def _device_kind() -> str:
    try:
        return jax.devices()[0].device_kind.lower()
    except Exception:
        return ""


_KIND = _device_kind()
# <= v5 chips: 128-wide MXU tiles and no bf16 VPU -> smaller batch tile, f32 epilogue.
_SMALL_CHIP = any(t in _KIND for t in ("v2", "v3", "v4", "v5"))
TILE_B_TARGET = 128 if _SMALL_CHIP else 256
BF16_EPILOGUE = not _SMALL_CHIP


def _layernorm_relu(z, bias, gamma, beta):
    """LayerNorm (stats in f32, clamped one-pass variance) + ReLU, emitted as bf16."""
    z = z + bias
    mean = jnp.mean(z, axis=-1, keepdims=True)
    mean2 = jnp.mean(z * z, axis=-1, keepdims=True)
    var = jnp.maximum(mean2 - mean * mean, 0.0)   # one-pass var can round < 0: clamp
    inv = jax.lax.rsqrt(var + LN_EPS)
    if BF16_EPILOGUE:
        # v6e/v7x: affine + ReLU in bf16 halves the VALU work of the LN epilogue.
        hn = ((z - mean) * inv).astype(jnp.bfloat16)
        h = hn * gamma.astype(jnp.bfloat16) + beta.astype(jnp.bfloat16)
        return jnp.maximum(h, 0.0)
    # <= v5: keep the VPU path strictly f32, cast once at the end.
    h = (z - mean) * inv * gamma + beta
    return jnp.maximum(h, 0.0).astype(jnp.bfloat16)


def dqn_kernel(x_ref, w1_ref, wh_ref, wv_ref, v0_ref, vh_ref, bv_ref, out_ref, h_ref):
    """One (batch-tile, hidden-layer) grid step.

    x_ref  : (TILE_B, STATE_PAD)      f32   resident across the layer axis
    w1_ref : (STATE_PAD, HIDDEN)      bf16  constant (zero-padded input rows)
    wh_ref : (1, HIDDEN, HIDDEN)      bf16  hidden layer k+1's weight (streamed per step)
    wv_ref : (HIDDEN, N_ACTIONS)      bf16  constant
    v0_ref : (3, HIDDEN)              f32   layer-0 bias / gamma / beta
    vh_ref : (1, 3, HIDDEN)           f32   layer-(k+1) bias / gamma / beta (streamed)
    bv_ref : (1, N_ACTIONS)           f32
    out_ref: (TILE_B, N_ACTIONS)      f32   written only at the last layer step
    h_ref  : (TILE_B, HIDDEN)         bf16  activation carry across the layer axis
    """
    k = pl.program_id(1)

    @pl.when(k == 0)
    def _input_layer():
        z = jnp.dot(x_ref[...].astype(jnp.bfloat16), w1_ref[...],
                    preferred_element_type=jnp.float32)
        h_ref[...] = _layernorm_relu(z, v0_ref[0:1, :], v0_ref[1:2, :], v0_ref[2:3, :])

    # Hidden layer k+1: its 512x512 bf16 weight block was prefetched during step k-1.
    vh = vh_ref[0]
    z = jnp.dot(h_ref[...], wh_ref[0], preferred_element_type=jnp.float32)
    h_ref[...] = _layernorm_relu(z, vh[0:1, :], vh[1:2, :], vh[2:3, :])
    # Dropout(0.1) -> identity in eval mode (last backbone layer is nn.Identity anyway).

    @pl.when(k == pl.num_programs(1) - 1)
    def _value_head():
        out_ref[...] = (jnp.dot(h_ref[...], wv_ref[...],
                                preferred_element_type=jnp.float32) + bv_ref[...])


def init_params(key, n_observations=STATE_DIM, n_actions=N_ACTIONS):
    """Xavier-uniform init (gain=sqrt(2), relu), zero biases, LayerNorm defaults.

    Returns:
      w1    : (STATE_PAD, HIDDEN)            bf16, rows >= n_observations are zero
      wh    : (NUM_HID, HIDDEN, HIDDEN)      bf16
      wv    : (HIDDEN, n_actions)            bf16
      vecs0 : (3, HIDDEN)                    f32  layer-0 [bias, gamma, beta]
      vecsh : (NUM_HID, 3, HIDDEN)           f32  per hidden layer [bias, gamma, beta]
      bv    : (1, n_actions)                 f32
    """
    gain = math.sqrt(2.0)

    def xavier(k, fan_in, fan_out):
        bound = gain * math.sqrt(6.0 / (fan_in + fan_out))
        return jax.random.uniform(k, (fan_in, fan_out), jnp.float32, -bound, bound)

    key, k1 = jax.random.split(key)
    w1 = xavier(k1, n_observations, HIDDEN_SIZE)
    w1 = jnp.pad(w1, ((0, STATE_PAD - n_observations), (0, 0))).astype(jnp.bfloat16)

    wh_list = []
    for _ in range(NUM_HID):
        key, k = jax.random.split(key)
        wh_list.append(xavier(k, HIDDEN_SIZE, HIDDEN_SIZE))
    wh = jnp.stack(wh_list).astype(jnp.bfloat16)

    key, kv = jax.random.split(key)
    wv = xavier(kv, HIDDEN_SIZE, n_actions).astype(jnp.bfloat16)

    one = jnp.stack([jnp.zeros(HIDDEN_SIZE, jnp.float32),    # Linear bias = 0
                     jnp.ones(HIDDEN_SIZE, jnp.float32),     # LN gamma = 1
                     jnp.zeros(HIDDEN_SIZE, jnp.float32)])   # LN beta = 0
    vecs0 = one                                              # (3, H)
    vecsh = jnp.tile(one[None], (NUM_HID, 1, 1))             # (NUM_HID, 3, H)

    bv = jnp.zeros((1, n_actions), jnp.float32)
    return (w1, wh, wv, vecs0, vecsh, bv)


@jax.jit
def dqn_forward(x, params):
    w1, wh, wv, vecs0, vecsh, bv = params
    batch, feat = x.shape
    state_pad = w1.shape[0]
    n_actions = wv.shape[-1]

    # Chip-adaptive batch tile; tiny action-selection batches get one short
    # (multiple-of-8) tile instead of being padded out to 128/256 rows.
    if batch >= TILE_B_TARGET:
        tile_b = TILE_B_TARGET
    else:
        tile_b = max(8, ((batch + 7) // 8) * 8)
    bpad = (-batch) % tile_b
    padded_batch = batch + bpad
    xp = jnp.pad(x.astype(jnp.float32), ((0, bpad), (0, state_pad - feat)))

    grid = (padded_batch // tile_b, NUM_HID)   # (batch tiles, streamed hidden layers)

    out = pl.pallas_call(
        dqn_kernel,
        out_shape=jax.ShapeDtypeStruct((padded_batch, n_actions), jnp.float32),
        grid=grid,
        in_specs=[
            pl.BlockSpec((tile_b, state_pad), lambda i, k: (i, 0)),      # x: tiled over batch
            pl.BlockSpec(w1.shape, lambda i, k: (0, 0)),                 # constant -> one DMA
            pl.BlockSpec((1, HIDDEN_SIZE, HIDDEN_SIZE),
                         lambda i, k: (k, 0, 0)),                        # streamed per layer
            pl.BlockSpec(wv.shape, lambda i, k: (0, 0)),                 # constant
            pl.BlockSpec(vecs0.shape, lambda i, k: (0, 0)),              # constant
            pl.BlockSpec((1, 3, HIDDEN_SIZE), lambda i, k: (k, 0, 0)),   # streamed per layer
            pl.BlockSpec(bv.shape, lambda i, k: (0, 0)),                 # constant
        ],
        out_specs=pl.BlockSpec((tile_b, n_actions), lambda i, k: (i, 0)),
        scratch_shapes=[pltpu.VMEM((tile_b, HIDDEN_SIZE), jnp.bfloat16)],  # activation carry
        compiler_params=pltpu.CompilerParams(
            dimension_semantics=("parallel", "arbitrary"),   # batch parallel, layers carried
            vmem_limit_bytes=32 * 1024 * 1024,
        ),
    )(xp, w1, wh, wv, vecs0, vecsh, bv)
    return out[:batch]


def dqn_forward_ref(x, params):
    """Pure-JAX reference mirroring the kernel numerics (bf16 matmul operands,
    f32 accumulation, f32 LN statistics, same epilogue dtype as the kernel)."""
    w1, wh, wv, vecs0, vecsh, bv = params
    feat = x.shape[1]
    z = jnp.dot(x.astype(jnp.bfloat16), w1[:feat], preferred_element_type=jnp.float32)
    h = _layernorm_relu(z, vecs0[0:1], vecs0[1:2], vecs0[2:3])
    for l in range(NUM_HID):
        z = jnp.dot(h, wh[l], preferred_element_type=jnp.float32)
        h = _layernorm_relu(z, vecsh[l, 0:1], vecsh[l, 1:2], vecsh[l, 2:3])
    return jnp.dot(h, wv, preferred_element_type=jnp.float32) + bv


if __name__ == "__main__":
    key = jax.random.PRNGKey(0)
    key, kx, kp = jax.random.split(key, 3)
    params = init_params(kp, STATE_DIM, N_ACTIONS)

    # Small action-selection style batch (adaptive padding -> one 8-row tile).
    batch = 8
    x = jax.random.normal(kx, (batch, STATE_DIM), jnp.float32)
    out = dqn_forward(x, params)
    jax.block_until_ready(out)
    assert out.shape == (batch, N_ACTIONS)
    ref = dqn_forward_ref(x, params)
    assert jnp.allclose(out, ref, atol=2e-2, rtol=2e-2), "mismatch vs reference (small batch)"

    # Replay-buffer sized batch to exercise the multi-tile, batch-parallel grid path.
    key, kx2 = jax.random.split(key)
    batch2 = 512
    x2 = jax.random.normal(kx2, (batch2, STATE_DIM), jnp.float32)
    out2 = dqn_forward(x2, params)
    jax.block_until_ready(out2)
    ref2 = dqn_forward_ref(x2, params)
    assert jnp.allclose(out2, ref2, atol=2e-2, rtol=2e-2), "mismatch vs reference (batched)"

    print("KERNEL_OK")
</pallas_src>

<mosaic_0001>
module attributes {stable_mosaic.version = 11 : i64} {
  func.func @dqn_kernel(%arg0: i32, %arg1: i32, %arg2: memref<8x128xf32, #tpu.memory_space<vmem>>, %arg3: memref<128x512xbf16, #tpu.memory_space<vmem>>, %arg4: memref<1x512x512xbf16, #tpu.memory_space<vmem>>, %arg5: memref<512x128xbf16, #tpu.memory_space<vmem>>, %arg6: memref<3x512xf32, #tpu.memory_space<vmem>>, %arg7: memref<1x3x512xf32, #tpu.memory_space<vmem>>, %arg8: memref<1x128xf32, #tpu.memory_space<vmem>>, %arg9: memref<8x128xf32, #tpu.memory_space<vmem>>, %arg10: memref<8x512xbf16, #tpu.memory_space<vmem>>) attributes {dimension_semantics = [#tpu.dimension_semantics<parallel>, #tpu.dimension_semantics<arbitrary>], iteration_bounds = array<i64: 1, 3>, scalar_prefetch = 0 : i64, scratch_operands = 1 : i64, tpu.core_type = #tpu.core_type<tc>, window_params = [{transform_indices = @transform_0, window_bounds = array<i64: 8, 128>}, {pipeline_mode = #tpu.pipeline_mode<synchronous>, transform_indices = @transform_1, window_bounds = array<i64: 128, 512>}, {transform_indices = @transform_2, window_bounds = array<i64: 1, 512, 512>}, {pipeline_mode = #tpu.pipeline_mode<synchronous>, transform_indices = @transform_3, window_bounds = array<i64: 512, 128>}, {pipeline_mode = #tpu.pipeline_mode<synchronous>, transform_indices = @transform_4, window_bounds = array<i64: 3, 512>}, {transform_indices = @transform_5, window_bounds = array<i64: 1, 3, 512>}, {pipeline_mode = #tpu.pipeline_mode<synchronous>, transform_indices = @transform_6, window_bounds = array<i64: 1, 128>}, {transform_indices = @transform_7, window_bounds = array<i64: 8, 128>}]} {
    %c0_i32 = arith.constant 0 : i32
    %0 = arith.cmpi eq, %arg1, %c0_i32 : i32
    %1 = arith.extui %0 : i1 to i32
    %c0_i32_0 = arith.constant 0 : i32
    %2 = arith.cmpi ne, %1, %c0_i32_0 : i32
    scf.if %2 {
      %c0_18 = arith.constant 0 : index
      %c0_19 = arith.constant 0 : index
      %47 = vector.load %arg2[%c0_18, %c0_19] : memref<8x128xf32, #tpu.memory_space<vmem>>, vector<8x128xf32>
      %48 = arith.truncf %47 : vector<8x128xf32> to vector<8x128xbf16>
      %c0_20 = arith.constant 0 : index
      %c0_21 = arith.constant 0 : index
      %49 = vector.load %arg3[%c0_20, %c0_21] : memref<128x512xbf16, #tpu.memory_space<vmem>>, vector<128x512xbf16>
      %cst_22 = arith.constant dense<0.000000e+00> : vector<8x512xf32>
      %50 = tpu.matmul %48, %49, %cst_22 {dimension_numbers = #tpu.dot_dimension_numbers<[1], [0], [0], [1], [0, 0, 1, 1], [], []>} : vector<8x128xbf16>, vector<128x512xbf16>, vector<8x512xf32> -> vector<8x512xf32>
      %c0_23 = arith.constant 0 : index
      %c0_24 = arith.constant 0 : index
      %51 = vector.load %arg6[%c0_23, %c0_24] : memref<3x512xf32, #tpu.memory_space<vmem>>, vector<1x512xf32>
      %c1 = arith.constant 1 : index
      %c0_25 = arith.constant 0 : index
      %52 = vector.load %arg6[%c1, %c0_25] : memref<3x512xf32, #tpu.memory_space<vmem>>, vector<1x512xf32>
      %c2 = arith.constant 2 : index
      %c0_26 = arith.constant 0 : index
      %53 = vector.load %arg6[%c2, %c0_26] : memref<3x512xf32, #tpu.memory_space<vmem>>, vector<1x512xf32>
      %54 = vector.broadcast %51 : vector<1x512xf32> to vector<8x512xf32>
      %55 = arith.addf %50, %54 : vector<8x512xf32>
      %cst_27 = arith.constant dense<0.000000e+00> : vector<8xf32>
      %56 = vector.multi_reduction <add>, %55, %cst_27 [1] : vector<8x512xf32> to vector<8xf32>
      %57 = vector.shape_cast %56 : vector<8xf32> to vector<8x1xf32>
      %cst_28 = arith.constant 5.120000e+02 : f32
      %58 = vector.broadcast %cst_28 : f32 to vector<8x1xf32>
      %59 = arith.divf %57, %58 : vector<8x1xf32>
      %60 = arith.mulf %55, %55 : vector<8x512xf32>
      %cst_29 = arith.constant dense<0.000000e+00> : vector<8xf32>
      %61 = vector.multi_reduction <add>, %60, %cst_29 [1] : vector<8x512xf32> to vector<8xf32>
      %62 = vector.shape_cast %61 : vector<8xf32> to vector<8x1xf32>
      %cst_30 = arith.constant 5.120000e+02 : f32
      %63 = vector.broadcast %cst_30 : f32 to vector<8x1xf32>
      %64 = arith.divf %62, %63 : vector<8x1xf32>
      %65 = arith.mulf %59, %59 : vector<8x1xf32>
      %66 = arith.subf %64, %65 : vector<8x1xf32>
      %cst_31 = arith.constant 0.000000e+00 : f32
      %67 = vector.broadcast %cst_31 : f32 to vector<8x1xf32>
      %68 = arith.maximumf %66, %67 : vector<8x1xf32>
      %cst_32 = arith.constant 9.99999974E-6 : f32
      %69 = vector.broadcast %cst_32 : f32 to vector<8x1xf32>
      %70 = arith.addf %68, %69 : vector<8x1xf32>
      %71 = math.rsqrt %70 : vector<8x1xf32>
      %72 = vector.broadcast %59 : vector<8x1xf32> to vector<8x512xf32>
      %73 = arith.subf %55, %72 : vector<8x512xf32>
      %74 = vector.broadcast %71 : vector<8x1xf32> to vector<8x512xf32>
      %75 = arith.mulf %73, %74 : vector<8x512xf32>
      %76 = arith.truncf %75 : vector<8x512xf32> to vector<8x512xbf16>
      %77 = arith.truncf %52 : vector<1x512xf32> to vector<1x512xbf16>
      %78 = vector.broadcast %77 : vector<1x512xbf16> to vector<8x512xbf16>
      %79 = arith.mulf %76, %78 : vector<8x512xbf16>
      %80 = arith.truncf %53 : vector<1x512xf32> to vector<1x512xbf16>
      %81 = vector.broadcast %80 : vector<1x512xbf16> to vector<8x512xbf16>
      %82 = arith.addf %79, %81 : vector<8x512xbf16>
      %cst_33 = arith.constant 0.000000e+00 : bf16
      %83 = vector.broadcast %cst_33 : bf16 to vector<8x512xbf16>
      %84 = arith.maximumf %82, %83 : vector<8x512xbf16>
      %c0_34 = arith.constant 0 : index
      %c0_35 = arith.constant 0 : index
      %85 = vector.load %arg10[%c0_34, %c0_35] : memref<8x512xbf16, #tpu.memory_space<vmem>>, vector<8x512xbf16>
      tpu.vector_store %arg10[%c0_34, %c0_35], %84 {strides = array<i32>} : memref<8x512xbf16, #tpu.memory_space<vmem>>, vector<8x512xbf16>,
    } else {
    }
    %c0 = arith.constant 0 : index
    %c0_1 = arith.constant 0 : index
    %c0_2 = arith.constant 0 : index
    %3 = vector.load %arg7[%c0, %c0_1, %c0_2] : memref<1x3x512xf32, #tpu.memory_space<vmem>>, vector<1x3x512xf32>
    %4 = vector.shape_cast %3 : vector<1x3x512xf32> to vector<3x512xf32>
    %c0_3 = arith.constant 0 : index
    %c0_4 = arith.constant 0 : index
    %5 = vector.load %arg10[%c0_3, %c0_4] : memref<8x512xbf16, #tpu.memory_space<vmem>>, vector<8x512xbf16>
    %c0_5 = arith.constant 0 : index
    %c0_6 = arith.constant 0 : index
    %c0_7 = arith.constant 0 : index
    %6 = vector.load %arg4[%c0_5, %c0_6, %c0_7] : memref<1x512x512xbf16, #tpu.memory_space<vmem>>, vector<1x512x512xbf16>
    %7 = vector.shape_cast %6 : vector<1x512x512xbf16> to vector<512x512xbf16>
    %cst = arith.constant dense<0.000000e+00> : vector<8x512xf32>
    %8 = tpu.matmul %5, %7, %cst {dimension_numbers = #tpu.dot_dimension_numbers<[1], [0], [0], [1], [0, 0, 1, 1], [], []>} : vector<8x512xbf16>, vector<512x512xbf16>, vector<8x512xf32> -> vector<8x512xf32>
    %9 = vector.extract_strided_slice %4 {offsets = [0, 0], sizes = [1, 512], strides = [1, 1]} : vector<3x512xf32> to vector<1x512xf32>
    %10 = vector.extract_strided_slice %4 {offsets = [1, 0], sizes = [1, 512], strides = [1, 1]} : vector<3x512xf32> to vector<1x512xf32>
    %11 = vector.extract_strided_slice %4 {offsets = [2, 0], sizes = [1, 512], strides = [1, 1]} : vector<3x512xf32> to vector<1x512xf32>
    %12 = vector.broadcast %9 : vector<1x512xf32> to vector<8x512xf32>
    %13 = arith.addf %8, %12 : vector<8x512xf32>
    %cst_8 = arith.constant dense<0.000000e+00> : vector<8xf32>
    %14 = vector.multi_reduction <add>, %13, %cst_8 [1] : vector<8x512xf32> to vector<8xf32>
    %15 = vector.shape_cast %14 : vector<8xf32> to vector<8x1xf32>
    %cst_9 = arith.constant 5.120000e+02 : f32
    %16 = vector.broadcast %cst_9 : f32 to vector<8x1xf32>
    %17 = arith.divf %15, %16 : vector<8x1xf32>
    %18 = arith.mulf %13, %13 : vector<8x512xf32>
    %cst_10 = arith.constant dense<0.000000e+00> : vector<8xf32>
    %19 = vector.multi_reduction <add>, %18, %cst_10 [1] : vector<8x512xf32> to vector<8xf32>
    %20 = vector.shape_cast %19 : vector<8xf32> to vector<8x1xf32>
    %cst_11 = arith.constant 5.120000e+02 : f32
    %21 = vector.broadcast %cst_11 : f32 to vector<8x1xf32>
    %22 = arith.divf %20, %21 : vector<8x1xf32>
    %23 = arith.mulf %17, %17 : vector<8x1xf32>
    %24 = arith.subf %22, %23 : vector<8x1xf32>
    %cst_12 = arith.constant 0.000000e+00 : f32
    %25 = vector.broadcast %cst_12 : f32 to vector<8x1xf32>
    %26 = arith.maximumf %24, %25 : vector<8x1xf32>
    %cst_13 = arith.constant 9.99999974E-6 : f32
    %27 = vector.broadcast %cst_13 : f32 to vector<8x1xf32>
    %28 = arith.addf %26, %27 : vector<8x1xf32>
    %29 = math.rsqrt %28 : vector<8x1xf32>
    %30 = vector.broadcast %17 : vector<8x1xf32> to vector<8x512xf32>
    %31 = arith.subf %13, %30 : vector<8x512xf32>
    %32 = vector.broadcast %29 : vector<8x1xf32> to vector<8x512xf32>
    %33 = arith.mulf %31, %32 : vector<8x512xf32>
    %34 = arith.truncf %33 : vector<8x512xf32> to vector<8x512xbf16>
    %35 = arith.truncf %10 : vector<1x512xf32> to vector<1x512xbf16>
    %36 = vector.broadcast %35 : vector<1x512xbf16> to vector<8x512xbf16>
    %37 = arith.mulf %34, %36 : vector<8x512xbf16>
    %38 = arith.truncf %11 : vector<1x512xf32> to vector<1x512xbf16>
    %39 = vector.broadcast %38 : vector<1x512xbf16> to vector<8x512xbf16>
    %40 = arith.addf %37, %39 : vector<8x512xbf16>
    %cst_14 = arith.constant 0.000000e+00 : bf16
    %41 = vector.broadcast %cst_14 : bf16 to vector<8x512xbf16>
    %42 = arith.maximumf %40, %41 : vector<8x512xbf16>
    %c0_15 = arith.constant 0 : index
    %c0_16 = arith.constant 0 : index
    %43 = vector.load %arg10[%c0_15, %c0_16] : memref<8x512xbf16, #tpu.memory_space<vmem>>, vector<8x512xbf16>
    tpu.vector_store %arg10[%c0_15, %c0_16], %42 {strides = array<i32>} : memref<8x512xbf16, #tpu.memory_space<vmem>>, vector<8x512xbf16>,
    %c2_i32 = arith.constant 2 : i32
    %44 = arith.cmpi eq, %arg1, %c2_i32 : i32
    %45 = arith.extui %44 : i1 to i32
    %c0_i32_17 = arith.constant 0 : i32
    %46 = arith.cmpi ne, %45, %c0_i32_17 : i32
    scf.if %46 {
      %c0_18 = arith.constant 0 : index
      %c0_19 = arith.constant 0 : index
      %47 = vector.load %arg10[%c0_18, %c0_19] : memref<8x512xbf16, #tpu.memory_space<vmem>>, vector<8x512xbf16>
      %c0_20 = arith.constant 0 : index
      %c0_21 = arith.constant 0 : index
      %48 = vector.load %arg5[%c0_20, %c0_21] : memref<512x128xbf16, #tpu.memory_space<vmem>>, vector<512x128xbf16>
      %cst_22 = arith.constant dense<0.000000e+00> : vector<8x128xf32>
      %49 = tpu.matmul %47, %48, %cst_22 {dimension_numbers = #tpu.dot_dimension_numbers<[1], [0], [0], [1], [0, 0, 1, 1], [], []>} : vector<8x512xbf16>, vector<512x128xbf16>, vector<8x128xf32> -> vector<8x128xf32>
      %c0_23 = arith.constant 0 : index
      %c0_24 = arith.constant 0 : index
      %50 = vector.load %arg8[%c0_23, %c0_24] : memref<1x128xf32, #tpu.memory_space<vmem>>, vector<1x128xf32>
      %51 = vector.broadcast %50 : vector<1x128xf32> to vector<8x128xf32>
      %52 = arith.addf %49, %51 : vector<8x128xf32>
      %c0_25 = arith.constant 0 : index
      %c0_26 = arith.constant 0 : index
      %53 = vector.load %arg9[%c0_25, %c0_26] : memref<8x128xf32, #tpu.memory_space<vmem>>, vector<8x128xf32>
      tpu.vector_store %arg9[%c0_25, %c0_26], %52 {strides = array<i32>} : memref<8x128xf32, #tpu.memory_space<vmem>>, vector<8x128xf32>,
    } else {
    }
    return
  }
  func.func @transform_0(%arg0: i32, %arg1: i32) -> (i32, i32) {
    %c0_i32 = arith.constant 0 : i32
    %c0_i32_0 = arith.constant 0 : i32
    return %arg0, %c0_i32 : i32, i32
  }
  func.func @transform_1(%arg0: i32, %arg1: i32) -> (i32, i32) {
    %c0_i32 = arith.constant 0 : i32
    %c0_i32_0 = arith.constant 0 : i32
    %c0_i32_1 = arith.constant 0 : i32
    return %c0_i32, %c0_i32_0 : i32, i32
  }
  func.func @transform_2(%arg0: i32, %arg1: i32) -> (i32, i32, i32) {
    %c0_i32 = arith.constant 0 : i32
    %c0_i32_0 = arith.constant 0 : i32
    %c0_i32_1 = arith.constant 0 : i32
    return %arg1, %c0_i32, %c0_i32_0 : i32, i32, i32
  }
  func.func @transform_3(%arg0: i32, %arg1: i32) -> (i32, i32) {
    %c0_i32 = arith.constant 0 : i32
    %c0_i32_0 = arith.constant 0 : i32
    %c0_i32_1 = arith.constant 0 : i32
    return %c0_i32, %c0_i32_0 : i32, i32
  }
  func.func @transform_4(%arg0: i32, %arg1: i32) -> (i32, i32) {
    %c0_i32 = arith.constant 0 : i32
    %c0_i32_0 = arith.constant 0 : i32
    %c0_i32_1 = arith.constant 0 : i32
    return %c0_i32, %c0_i32_0 : i32, i32
  }
  func.func @transform_5(%arg0: i32, %arg1: i32) -> (i32, i32, i32) {
    %c0_i32 = arith.constant 0 : i32
    %c0_i32_0 = arith.constant 0 : i32
    %c0_i32_1 = arith.constant 0 : i32
    return %arg1, %c0_i32, %c0_i32_0 : i32, i32, i32
  }
  func.func @transform_6(%arg0: i32, %arg1: i32) -> (i32, i32) {
    %c0_i32 = arith.constant 0 : i32
    %c0_i32_0 = arith.constant 0 : i32
    %c0_i32_1 = arith.constant 0 : i32
    return %c0_i32, %c0_i32_0 : i32, i32
  }
  func.func @transform_7(%arg0: i32, %arg1: i32) -> (i32, i32) {
    %c0_i32 = arith.constant 0 : i32
    %c0_i32_0 = arith.constant 0 : i32
    return %arg0, %c0_i32 : i32, i32
  }
}

</mosaic_0001>

<bundles_post_ra>
// kernel: dqn_forward.1
= control target key start
LH: loop header
LB: loop body
LE: loop exit
PB: predicated region body
PF: predicated region fallthrough
CT: control target
= control target key end

     0   :  { %s3966_s0 = inlined_call_operand.vmem [shape: f32[8,128], index: 0, kind: input, shape index: {}]   ;;  %s3967_s1 = inlined_call_operand.hbm [shape: bf16[128,512], index: 1, kind: input, shape index: {}]   ;;  %s3968_s2 = inlined_call_operand.hbm [shape: bf16[3,512,512], index: 2, kind: input, shape index: {}]   ;;  %s3969_s3 = inlined_call_operand.hbm [shape: bf16[512,128], index: 3, kind: input, shape index: {}]   ;;  %s3970_s4 = inlined_call_operand.hbm [shape: f32[3,512], index: 4, kind: input, shape index: {}]   ;;  %s3971_s5 = inlined_call_operand.hbm [shape: f32[3,3,512], index: 5, kind: input, shape index: {}]   ;;  %s3972_s6 = inlined_call_operand.hbm [shape: f32[1,128], index: 6, kind: input, shape index: {}]   ;;  %s3973_s7 = inlined_call_operand.hbm [shape: f32[8,128], index: 7, kind: output, shape index: {}]  }
   0x1   :  { %3980 = sst [smem:[#allocation21_spill]] %s3967_s1 }
   0x2   :  { %3981 = sst [smem:[#allocation22_spill]] %s3968_s2 }
   0x3   :  { %3982 = sst [smem:[#allocation23_spill]] %s3969_s3 }
   0x4   :  { %3983 = sst [smem:[#allocation24_spill]] %s3970_s4 }
   0x5   :  { %3984 = sst [smem:[#allocation25_spill]] %s3972_s6 }
   0x6   :  { %12 = vsyncpa [#allocation4], 0 }
   0x7   :  { %13 = vsyncpa [#allocation7], 0 }
   0x8   :  { %15 = vsyncpa [#allocation7 + $0x1], 0 }
   0x9   :  { %16 = vsyncpa [#allocation10], 0 }
   0xa   :  { %17 = vsyncpa [#allocation5], 0  ;;  %s3535_s24 = smov 0   ;;  %s3537_s25 = smov 0  }
   0xb   :  { %s3539_s26 = smov 0   ;;  %s3541_s27 = smov 0  }
   0xc   :  { %s3543_s28 = smov 0   ;;  %s3545_s29 = smov 0  }
   0xd LB: > { %s3564_s30 = sadd.s32 4294967295, %s3480_s29   ;;  %p102_p0 = scmp.ne.s32.totalorder %s3464_s25, %s3460_s24  ;;  %s3480_s29 = sphi %s3545_s29, %s23_s29   ;;  %s3476_s28 = sphi %s3543_s28, %s4012_s28   ;;  %s3472_s27 = sphi %s3541_s27, %s4011_s27   ;;  %s3468_s26 = sphi %s3539_s26, %s4010_s26   ;;  %s3464_s25 = sphi %s3537_s25, %s4009_s25   ;;  %s3460_s24 = sphi %s3535_s24, %s4008_s24  }
   0xe   : > { %p3974_p1 = scmp.eq.s32.totalorder %s3564_s30, 0  ;;  %p2547_p2 = scmp.ge.s32.totalorder %s3480_s29, 1 }
   0xf   : > { %p228_p3 = scmp.lt.s32.totalorder %s3480_s29, 4  ;;  %s3482_s10 = smov [#allocation8]  }
  0x10   : > { %p3572_p4 = por %p3974_p1, %p102_p0  ;;  %s260_s11 = sshll.u32 %s3482_s10, 4  ;;  %s261_s11 = int_to_ptr.vmem [resolvable:$true] %s260_s11 }
  0x11   : > { %p3576_p5 = pnand %p2547_p2, %p228_p3  ;;  %s3483_s13 = smov [#allocation3]  }
  0x12   : > { %s3985_s8 = scalar_select %p3572_p4, 1, 0 }
  0x13   : > { %s3986_s9 = scalar_select %p3576_p5, 1, 0 }
  0x14   : > { %p2848_p6 = pneg %p3576_p5  ;;  %s247_s14 = sshll.u32 %s3483_s13, 4  ;;  %s248_s14 = int_to_ptr.vmem [resolvable:$true] %s247_s14 }
  0x15   : > { %s3233_s15 = scalar_lea.vmem %s261_s11, 4096  ;;  %p3241_p12 = scmp.lt.s32.totalorder %s261_s11, %s261_s11 }
  0x16   : > { %p3584_p7 = pnand %p2848_p6, %p3974_p1  ;;  %p3234_p9 = scmp.ne.s32.totalorder %s261_s11, %s3233_s15 }
  0x17   : > { %p3242_p13 = scmp.lt.s32.totalorder %s3233_s15, %s3233_s15 }
  0x18   : > { %p3224_p8 = pneg %p3584_p7 }
  0x19   : > { %p3243_p0 = por %p3242_p13, %p3241_p12 }
  0x1a   : > { %p3236_p10 = pnand %p3234_p9, %p3224_p8 }
  0x1c   : > { %p3237_p11 = pneg %p3236_p10 }
  0x1e   : > { %p3244_p2 = pnand %p3243_p0, %p3237_p11 }
  0x20   : > { %3247 = shalt.err (!%p3244_p2)
}
  0x21   : > { %s3484_s16 = smov 64   ;;  %s3485_s17 = smov 4  }
  0x22   : > { %s3988_s3 = sld [smem:[#allocation23_spill]]  ;;  %s3259_s20 = scalar_lea.vmem %s248_s14, 4096 }
  0x23   : > { %p3260_p3 = scmp.ne.s32.totalorder %s248_s14, %s3259_s20  ;;  %p3267_p10 = scmp.lt.s32.totalorder %s248_s14, %s248_s14 }
  0x24   : > { %p3268_p12 = scmp.lt.s32.totalorder %s3259_s20, %s3259_s20 }
  0x25   : > { %p3262_p6 = pnand %p3260_p3, %p3224_p8 }
  0x26   : > { %p3269_p11 = por %p3268_p12, %p3267_p10 }
  0x27   : > { %p3263_p9 = pneg %p3262_p6 }
  0x28   : > { %2854 = dma.hbm_to_vmem [thread:$0]  (!%p3584_p7), %s3988_s3, 4096, %s261_s11, [#allocation7], %s3484_s16, %s3484_s16, %s3485_s17  }
  0x29   : > { %p3270_p13 = pnand %p3269_p11, %p3263_p9 }
  0x2b   : > { %3273 = shalt.err (!%p3270_p13)
}
  0x2c   : > { %s3977_s21 = smov 256   ;;  %s3978_s22 = smov 16  }
  0x2d   : > { %s3989_s1 = sld [smem:[#allocation21_spill]]  ;;  %s3488_s10 = smov [#allocation12]  }
  0x2e   : > { %s285_s11 = sshll.u32 %s3488_s10, 4  ;;  %s3489_s13 = smov [#allocation9]   ;;  %s286_s11 = int_to_ptr.vmem [resolvable:$true] %s285_s11 }
  0x2f   : > { %s274_s15 = sshll.u32 %s3489_s13, 4  ;;  %s3285_s16 = scalar_lea.vmem %s286_s11, 16  ;;  %s275_s15 = int_to_ptr.vmem [resolvable:$true] %s274_s15 }
  0x30   : > { %p3286_p0 = scmp.ne.s32.totalorder %s286_s11, %s3285_s16  ;;  %s3292_s17 = scalar_lea.vmem %s286_s11, 32 }
  0x31   : > { %p3293_p6 = scmp.lt.s32.totalorder %s286_s11, %s286_s11  ;;  %p3294_p9 = scmp.lt.s32.totalorder %s3292_s17, %s3285_s16 }
  0x32   : > { %p3288_p2 = pnand %p3286_p0, %p3224_p8 }
  0x33   : > { %2851 = dma.hbm_to_vmem [thread:$0]  (!%p3584_p7), %s3989_s1, 4096, %s248_s14, [#allocation4], %s3977_s21, %s3977_s21, %s3978_s22  }
  0x34   : > { %p3289_p3 = pneg %p3288_p2  ;;  %p3295_p10 = por %p3294_p9, %p3293_p6 }
  0x36   : > { %p3296_p12 = pnand %p3295_p10, %p3289_p3 }
  0x38   : > { %3299 = shalt.err (!%p3296_p12)
}
  0x39   : > { %s3990_s6 = sld [smem:[#allocation25_spill]]  ;;  %s3311_s19 = scalar_lea.vmem %s275_s15, 256 }
  0x3a   : > { %p3312_p11 = scmp.ne.s32.totalorder %s275_s15, %s3311_s19  ;;  %p3319_p2 = scmp.lt.s32.totalorder %s275_s15, %s275_s15 }
  0x3b   : > { %p3320_p1 = scmp.lt.s32.totalorder %s3311_s19, %s3311_s19 }
  0x3c   : > { %p3314_p13 = pnand %p3312_p11, %p3224_p8 }
  0x3d   : > { %p3321_p4 = por %p3320_p1, %p3319_p2 }
  0x3e   : > { %p3315_p0 = pneg %p3314_p13 }
  0x3f   : > { %2860 = dma.hbm_to_vmem [thread:$0]  (!%p3584_p7), %s3990_s6, 16, %s286_s11, [#allocation7]  }
  0x40   : > { %p3322_p5 = pnand %p3321_p4, %p3315_p0 }
  0x42   : > { %3325 = shalt.err (!%p3322_p5)
}
  0x43   : > { %s3991_s4 = sld [smem:[#allocation24_spill]]  ;;  %s32_s24 = sadd.s32 1, %s3476_s28 }
  0x44   : > { %s89_s10 = sadd.s32 1, %s3468_s26  ;;  %p33_p1 = scmp.ge.s32.totalorder %s32_s24, 3 }
  0x45   : > { %p96_p4 = scmp.ne.s32.totalorder %s3468_s26, %s3464_s25  ;;  %p97_p5 = scmp.eq.s32.totalorder %s3480_s29, 0 }
  0x46   : > { %p2872_p8 = scmp.lt.s32.totalorder %s3480_s29, 3  ;;  %s4014_s24 = smov (%p33_p1, %s32_s24), 0 }
  0x47   : > { %p98_p3 = por %p97_p5, %p96_p4  ;;  %s3979_s12 = sand.u32 1, %s3480_s29  }
  0x48   : > { %s86_s11 = ssub.s32 %s3476_s28, %s4014_s24  ;;  %s298_s13 = sand.u32 1, %s3468_s26  }
  0x49   : > { %2857 = dma.hbm_to_vmem [thread:$0]  (!%p3584_p7), %s3991_s4, 256, %s275_s15, [#allocation10]  }
  0x4a   : > { %p87_p6 = scmp.eq.s32.totalorder %s86_s11, 0  ;;  %s2554_s16 = sshll.u32 %s298_s13, 10 }
  0x4b   : > { %s2778_s17 = sshll.u32 %s3476_s28, 14  ;;  %s3992_s2 = sld [smem:[#allocation22_spill]] }
  0x4c   : > { %s3639_s14 = scalar_select %p87_p6, %s3468_s26, %s89_s10  }
  0x4d   : > { %s300_s20 = scalar_lea.vmem [#allocation6], %s2554_s16  ;;  %p3646_p7 = pnand %p2872_p8, %p98_p3 }
  0x4e   : > { %s307_s23 = sshll.u32 %s300_s20, 4  ;;  %s2557_s11 = sshll.u32 %s298_s13, 4  ;;  %s308_s23 = int_to_ptr.vmem [resolvable:$true] %s307_s23 }
  0x4f   : > { %s297_s22 = scalar_lea.sflag [#allocation7], %s3979_s12  ;;  %p3328_p9 = pneg %p3646_p7 }
  0x50   : > { %s3339_s10 = scalar_lea.vmem %s308_s23, 16384  ;;  %s3490_s16 = smov [#allocation6]  }
  0x51   : > { %s306_s19 = scalar_lea.hbm %s3992_s2, %s2778_s17  ;;  %p3340_p10 = scmp.ne.s32.totalorder %s308_s23, %s3339_s10 }
  0x52   : > { %s3344_s17 = sshll.u32 %s3490_s16, 4  ;;  %s3345_s17 = int_to_ptr.vmem [resolvable:$false] %s3344_s17 }
  0x53   : > { %p3342_p12 = pnand %p3340_p10, %p3328_p9  ;;  %s3346_s15 = scalar_lea.vmem %s3345_s17, 32768 }
  0x54   : > { %p3347_p13 = scmp.lt.s32.totalorder %s308_s23, %s3345_s17  ;;  %p3348_p0 = scmp.lt.s32.totalorder %s3346_s15, %s3339_s10 }
  0x55   : > { %p3343_p11 = pneg %p3342_p12 }
  0x56   : > { %p3349_p2 = por %p3348_p0, %p3347_p13 }
  0x58   : > { %p3350_p1 = pnand %p3349_p2, %p3343_p11 }
  0x5a   : > { %3353 = shalt.err (!%p3350_p1)
}
  0x5b   : > { %s3994_s13 = smov 16   ;;  %s3995_s18 = smov 256  }
  0x5c   : > { %2864 = dma.hbm_to_vmem [thread:$0]  (!%p3646_p7), %s306_s19, 16384, %s308_s23, %s297_s22, %s3995_s18, %s3995_s18, %s3994_s13  }
  0x5d   : > { %s2779_s20 = sshll.u32 %s3476_s28, 8  ;;  %s321_s2 = scalar_lea.vmem [#allocation11], %s2557_s11 }
  0x5e   : > { %s327_s16 = scalar_lea.hbm %s3971_s5, %s2779_s20  ;;  %s329_s17 = sshll.u32 %s321_s2, 4  ;;  %s330_s17 = int_to_ptr.vmem [resolvable:$true] %s329_s17 }
  0x5f   : > { %s3996_s10 = sand.u32 1, %s3480_s29   ;;  %s3367_s3 = scalar_lea.vmem %s330_s17, 256 }
  0x60   : > { %s318_s15 = scalar_lea.sflag [#allocation4], %s3996_s10  ;;  %p3368_p4 = scmp.ne.s32.totalorder %s330_s17, %s3367_s3 }
  0x61   : > { %s3491_s4 = smov [#allocation11]  }
  0x62   : > { %p3370_p5 = pnand %p3368_p4, %p3328_p9  ;;  %s3372_s6 = sshll.u32 %s3491_s4, 4  ;;  %s3373_s6 = int_to_ptr.vmem [resolvable:$false] %s3372_s6 }
  0x63   : > { %s3374_s22 = scalar_lea.vmem %s3373_s6, 512  ;;  %p3375_p3 = scmp.lt.s32.totalorder %s330_s17, %s3373_s6 }
  0x64   : > { %p3371_p8 = pneg %p3370_p5  ;;  %p3376_p6 = scmp.lt.s32.totalorder %s3374_s22, %s3367_s3 }
  0x66   : > { %p3377_p10 = por %p3376_p6, %p3375_p3 }
  0x68   : > { %p3378_p12 = pnand %p3377_p10, %p3371_p8 }
  0x6a   : > { %3381 = shalt.err (!%p3378_p12)
}
  0x6b   : > { %2867 = dma.hbm_to_vmem [thread:$0]  (!%p3646_p7), %s327_s16, 256, %s330_s17, %s318_s15  }
  0x6c   : > { %p3997_p11 = scmp.ne.s32.totalorder %s3986_s9, 0 }
  0x6d   : > { %p3998_p13 = scmp.eq.s32.totalorder (!%p3997_p11), %s3564_s30, 0 }
  0x6e   : > { %338 = sbr.rel (%p3997_p11) target bundleno = 1313 (0x521), region = 48 }
  0x73   : > { %3431 = dma.done.wait (%p3998_p13), [#allocation4], 4096   ;;  %p3999_p9 = pmov %p3998_p13 }
  0x74   : > { %s344_s1 = sand.u32 1, %s3564_s30   ;;  %s346_s2 = sand.u32 1, %s3464_s25  }
  0x75   : > { %3433 = vsyncadd (%p3999_p9), [#allocation4], 4294963200  ;;  %s2562_s3 = sshll.u32 %s346_s2, 10  ;;  %s345_s4 = scalar_lea.sflag [#allocation7], %s344_s1 }
  0x76   : > { %s3681_s6 = scalar_lea.vmem [#allocation6], %s2562_s3  ;;  %p4000_p0 = scmp.ne.s32.totalorder %s3985_s8, 0 }
  0x78   : > { %3435 = dma.done.wait (%p4000_p0), %s345_s4, 16384  }
  0x79   : > { %3437 = vsyncadd (%p4000_p0), %s345_s4, 4294950912  ;;  %p4001_p7 = pmov %p3999_p9 }
  0x7b   : > { %3439 = dma.done.wait (%p4001_p7), [#allocation7], 4096   ;;  %p4002_p2 = pmov %p4001_p7 }
  0x7d   : > { %3441 = vsyncadd (%p4002_p2), [#allocation7], 4294963200  ;;  %p4003_p1 = pmov %p4002_p2 }
  0x7f   : > { %3443 = dma.done.wait (%p4003_p1), [#allocation10], 256   ;;  %p4004_p4 = pmov %p4003_p1 }
  0x80   : > { %s3695_s9 = sshll.u32 %s346_s2, 4  ;;  %s362_s21 = scalar_lea.sflag [#allocation4], %s344_s1 }
  0x81   : > { %3445 = vsyncadd (%p4004_p4), [#allocation10], 4294967040  ;;  %s365_s12 = scalar_lea.vmem [#allocation11], %s3695_s9 }
  0x82   : > { %3447 = dma.done.wait (%p4000_p0), %s362_s21, 256  }
  0x83   : > { %3449 = vsyncadd (%p4000_p0), %s362_s21, 4294967040  ;;  %p4005_p5 = pmov %p4003_p1 }
  0x84   : > { %p4006_p8 = pmov %p4003_p1 }
  0x85   : > { %3451 = dma.done.wait (%p4005_p5), [#allocation7], 16  }
  0x86   : > { %3453 = vsyncadd (%p4006_p8), [#allocation7], 4294967280  ;;  %p2567_p3 = scmp.ne.s32.totalorder %s3472_s27, 0 }
  0x88   : > { %412 = sbr.rel (%p2567_p3) target bundleno = 555 (0x22b), region = 76 }
  0x8d   : > { %v2938_v0 = vld [vmem:[#allocation3 + $0xe4] ss:$16 sps:$4 sm:$0xff]   ;;  %v2940_v1 = vld [vmem:[#allocation3 + $0xec] ss:$16 sps:$4 sm:$0xff]   ;;  %v3492_v2 = vmov 0   ;;  %v453_v35 = vlaneseq }
  0x8e   : > { %665 = vmatprep.mubr.bf16.mxu0 %v3492_v2  ;;  %706 = vmatprep.mubr.bf16.mxu1 %v3492_v2  ;;  %v2942_v3 = vld [vmem:[#allocation3 + $0xe0] ss:$16 sps:$4 sm:$0xff]   ;;  %v2943_v4 = vld [vmem:[#allocation3 + $0xe8] ss:$16 sps:$4 sm:$0xff]   ;;  %v2944_v5 = vld [vmem:[#allocation3 + $0xc4] ss:$16 sps:$4 sm:$0xff]  }
  0x8f   : > { %633 = vmatprep.subr.bf16.mxu0 %v2938_v0  ;;  %674 = vmatprep.subr.bf16.mxu1 %v2940_v1  ;;  %v2946_v6 = vld [vmem:[#allocation3 + $0xcc] ss:$16 sps:$4 sm:$0xff]   ;;  %v2948_v7 = vld [vmem:[#allocation3 + $0xc0] ss:$16 sps:$4 sm:$0xff]   ;;  %v2949_v8 = vld [vmem:[#allocation3 + $0xc8] ss:$16 sps:$4 sm:$0xff]  }
  0x90   : > { %634 = vmatpush1.bf16.msra.mxu0 %v2942_v3  ;;  %675 = vmatpush1.bf16.msra.mxu1 %v2943_v4  ;;  %v2950_v9 = vld [vmem:[#allocation3 + $0xa4] ss:$16 sps:$4 sm:$0xff]   ;;  %v2952_v10 = vld [vmem:[#allocation3 + $0xac] ss:$16 sps:$4 sm:$0xff]   ;;  %v2954_v11 = vld [vmem:[#allocation3 + $0xa0] ss:$16 sps:$4 sm:$0xff]  }
  0x91   : > { %635 = vmatprep.subr.bf16.mxu0 %v2944_v5  ;;  %676 = vmatprep.subr.bf16.mxu1 %v2946_v6  ;;  %v2955_v12 = vld [vmem:[#allocation3 + $0xa8] ss:$16 sps:$4 sm:$0xff]   ;;  %v2956_v13 = vld [vmem:[#allocation3 + $0x84] ss:$16 sps:$4 sm:$0xff]   ;;  %v2958_v14 = vld [vmem:[#allocation3 + $0x8c] ss:$16 sps:$4 sm:$0xff]  }
  0x92   : > { %v2960_v15 = vld [vmem:[#allocation3 + $0x80] ss:$16 sps:$4 sm:$0xff]   ;;  %v2961_v16 = vld [vmem:[#allocation3 + $0x88] ss:$16 sps:$4 sm:$0xff]   ;;  %v2962_v17 = vld [vmem:[#allocation3 + $0x64] ss:$16 sps:$4 sm:$0xff]  }
  0x93   : > { %v2964_v18 = vld [vmem:[#allocation3 + $0x6c] ss:$16 sps:$4 sm:$0xff]   ;;  %v2966_v19 = vld [vmem:[#allocation3 + $0x60] ss:$16 sps:$4 sm:$0xff]   ;;  %v2967_v20 = vld [vmem:[#allocation3 + $0x68] ss:$16 sps:$4 sm:$0xff]  }
  0x94   : > { %636 = vmatpush1.bf16.msra.mxu0 %v2948_v7  ;;  %677 = vmatpush1.bf16.msra.mxu1 %v2949_v8  ;;  %v2968_v21 = vld [vmem:[#allocation3 + $0x44] ss:$16 sps:$4 sm:$0xff]   ;;  %v2970_v22 = vld [vmem:[#allocation3 + $0x4c] ss:$16 sps:$4 sm:$0xff]   ;;  %v2972_v23 = vld [vmem:[#allocation3 + $0x40] ss:$16 sps:$4 sm:$0xff]  }
  0x95   : > { %637 = vmatprep.subr.bf16.mxu0 %v2950_v9  ;;  %678 = vmatprep.subr.bf16.mxu1 %v2952_v10  ;;  %v2973_v24 = vld [vmem:[#allocation3 + $0x48] ss:$16 sps:$4 sm:$0xff]   ;;  %v2974_v25 = vld [vmem:[#allocation3 + $0x24] ss:$16 sps:$4 sm:$0xff]   ;;  %v2976_v26 = vld [vmem:[#allocation3 + $0x2c] ss:$16 sps:$4 sm:$0xff]  }
  0x96   : > { %v2978_v27 = vld [vmem:[#allocation3 + $0x20] ss:$16 sps:$4 sm:$0xff]   ;;  %v2979_v28 = vld [vmem:[#allocation3 + $0x28] ss:$16 sps:$4 sm:$0xff]   ;;  %v2980_v29 = vld [vmem:[#allocation3 + $0x4] ss:$16 sps:$4 sm:$0xff]  }
  0x97   : > { %v2982_v30 = vld [vmem:[#allocation3 + $0xc] ss:$16 sps:$4 sm:$0xff]   ;;  %v2984_v31 = vld [vmem:[#allocation3] ss:$16 sps:$4 sm:$0xff]   ;;  %v2985_v32 = vld [vmem:[#allocation3 + $0x8] ss:$16 sps:$4 sm:$0xff]  }
  0x98   : > { %638 = vmatpush1.bf16.msra.mxu0 %v2954_v11  ;;  %679 = vmatpush1.bf16.msra.mxu1 %v2955_v12  ;;  %v413_v33 = vld [vmem:[%s3966_s0] sm:$0xff]  ;;  %v454_v36 = vshrl.u32 %v453_v35, 7  ;;  %v447_v39 = vld [vmem:[#allocation9] ss:$4 sm:$0xf] }
  0x99   : > { %639 = vmatprep.subr.bf16.mxu0 %v2956_v13  ;;  %680 = vmatprep.subr.bf16.mxu1 %v2958_v14  ;;  %v414_v34 = vpack.c.bf16 %v413_v33, %v413_v33  ;;  %v449_v12 = vld [vmem:[#allocation9 + $0x1] ss:$4 sm:$0xf]  ;;  %v451_v14 = vld [vmem:[#allocation9 + $0x2] ss:$4 sm:$0xf] }
  0x9a   : > { %v3712_v37 = vsub.s32 0, %v454_v36  ;;  %v463_v38 = vsub.s32 2, %v454_v36  ;;  %v459_v40 = vsub.s32 1, %v454_v36  ;;  %v467_v44 = vsub.s32 3, %v454_v36 }
  0x9c   : > { %640 = vmatpush1.bf16.msra.mxu0 %v2960_v15  ;;  %681 = vmatpush1.bf16.msra.mxu1 %v2961_v16  ;;  %v456_v41 = vrot.slane %v447_v39, %v3712_v37  ;;  %v464_v42 = vrot.slane %v447_v39, %v463_v38  ;;  %v460_v43 = vrot.slane %v447_v39, %v459_v40 }
  0x9d   : > { %641 = vmatprep.subr.bf16.mxu0 %v2962_v17  ;;  %682 = vmatprep.subr.bf16.mxu1 %v2964_v18  ;;  %v468_v52 = vrot.slane %v447_v39, %v467_v44  ;;  %v753_v15 = vrot.slane %v449_v12, %v3712_v37  ;;  %v761_v16 = vrot.slane %v449_v12, %v463_v38 }
  0x9e   : > { %v757_v17 = vrot.slane %v449_v12, %v459_v40  ;;  %v765_v18 = vrot.slane %v449_v12, %v467_v44 }
  0xa0   : > { %642 = vmatpush1.bf16.msra.mxu0 %v2966_v19  ;;  %683 = vmatpush1.bf16.msra.mxu1 %v2967_v20  ;;  %v810_v19 = vrot.slane %v451_v14, %v3712_v37  ;;  %v818_v20 = vrot.slane %v451_v14, %v463_v38 }
  0xa1   : > { %643 = vmatprep.subr.bf16.mxu0 %v2968_v21  ;;  %684 = vmatprep.subr.bf16.mxu1 %v2970_v22  ;;  %v814_v21 = vrot.slane %v451_v14, %v459_v40  ;;  %v822_v22 = vrot.slane %v451_v14, %v467_v44 }
  0xa4   : > { %644 = vmatpush1.bf16.msra.mxu0 %v2972_v23  ;;  %685 = vmatpush1.bf16.msra.mxu1 %v2973_v24  ;;  %v770_v23 = vpack.c.bf16 %v753_v15, %v753_v15  ;;  %v772_v24 = vpack.c.bf16 %v761_v16, %v761_v16 }
  0xa5   : > { %645 = vmatprep.subr.bf16.mxu0 %v2974_v25  ;;  %686 = vmatprep.subr.bf16.mxu1 %v2976_v26  ;;  %v771_v25 = vpack.c.bf16 %v757_v17, %v757_v17  ;;  %v773_v26 = vpack.c.bf16 %v765_v18, %v765_v18 }
  0xa7   : > { %v782_v33 = vpack.i.b16 %v771_v25, %v771_v25 }
  0xa8   : > { %646 = vmatpush1.bf16.msra.mxu0 %v2978_v27  ;;  %687 = vmatpush1.bf16.msra.mxu1 %v2979_v28  ;;  %v827_v27 = vpack.c.bf16 %v810_v19, %v810_v19  ;;  %v829_v28 = vpack.c.bf16 %v818_v20, %v818_v20 }
  0xa9   : > { %647 = vmatprep.subr.bf16.mxu0 %v2980_v29  ;;  %688 = vmatprep.subr.bf16.mxu1 %v2982_v30  ;;  %v828_v29 = vpack.c.bf16 %v814_v21, %v814_v21  ;;  %v830_v30 = vpack.c.bf16 %v822_v22, %v822_v22 }
  0xaa   : > { %v832_v35 = vpack.i.b16 %v827_v27, %v827_v27  ;;  %v846_v36 = vpack.i.b16 %v829_v28, %v829_v28 }
  0xab   : > { %v839_v39 = vpack.i.b16 %v828_v29, %v828_v29 }
  0xac   : > { %648 = vmatpush1.bf16.msra.mxu0 %v2984_v31  ;;  %689 = vmatpush1.bf16.msra.mxu1 %v2985_v32  ;;  %v775_v31 = vpack.i.b16 %v770_v23, %v770_v23  ;;  %v789_v32 = vpack.i.b16 %v772_v24, %v772_v24 }
  0xaf   : > { %666 = vmatmul.mubr.bf16.vlgmr.msra.gmra.mxu0 %v414_v34  ;;  %707 = vmatmul.mubr.bf16.vlgmr.msra.gmra.mxu1 %v414_v34  ;;  %v796_v34 = vpack.i.b16 %v773_v26, %v773_v26 }
 0x16f   : > { %v667_v45 = vpop.f32.mrf.mxu0  ;;  %v708_v46 = vpop.f32.mrf.mxu1 }
 0x170   : > { %v3715_v47 = vadd.f32 %v667_v45, %v456_v41  ;;  %v3717_v48 = vadd.f32 %v708_v46, %v464_v42  ;;  %v853_v41 = vpack.i.b16 %v830_v30, %v830_v30  ;;  %v780_v45 = vrot.slane %v775_v31, %v3712_v37 }
 0x171   : > { %v669_v49 = vpop.f32.mrf.mxu0  ;;  %v710_v50 = vpop.f32.mrf.mxu1  ;;  %v794_v46 = vrot.slane %v789_v32, %v3712_v37 }
 0x172   : > { %v3719_v51 = vadd.f32 %v669_v49, %v460_v43  ;;  %v722_v55 = vmul.f32 %v3715_v47, %v3715_v47  ;;  %v724_v56 = vmul.f32 %v3717_v48, %v3717_v48  ;;  %v711_v61 = vadd.f32 %v710_v50, %v468_v52 }
 0x173   : > { %v671_v53 = vpop.f32.mrf.mxu0  ;;  %v712_v54 = vpop.f32.mrf.mxu1  ;;  %v787_v49 = vrot.slane %v782_v33, %v3712_v37  ;;  %v801_v50 = vrot.slane %v796_v34, %v3712_v37 }
 0x174   : > { %v723_v57 = vmul.f32 %v3719_v51, %v3719_v51  ;;  %v715_v58 = vadd.f32 %v3719_v51, %v3715_v47  ;;  %v725_v3 = vmul.f32 %v711_v61, %v711_v61 }
 0x175   : > { %v672_v59 = vpop.f32.mrf.mxu0  ;;  %v713_v60 = vpop.f32.mrf.mxu1 }
 0x176   : > { %v716_v62 = vadd.f32 %v715_v58, %v3717_v48  ;;  %v726_v63 = vadd.f32 %v723_v57, %v722_v55 }
 0x178   : > { %v717_v0 = vadd.f32 %v716_v62, %v711_v61  ;;  %v727_v1 = vadd.f32 %v726_v63, %v724_v56  ;;  %v858_v56 = vrot.slane %v853_v41, %v3712_v37 }
 0x17a   : > { %718 = vadd.xlane.f32.xlu0 %v717_v0  ;;  %v728_v4 = vadd.f32 %v727_v1, %v725_v3 }
 0x17e   : > { %729 = vadd.xlane.f32.xlu0 %v728_v4 }
 0x203   : > { %v719_v5 = vpop.xlane.xlu0 %718 }
 0x204   : > { %v721_v6 = vmul.f32 0.001953125, %v719_v5 }
 0x206   : > { %v732_v8 = vmul.f32 %v721_v6, %v721_v6  ;;  %v737_v38 = vsub.f32 %v3715_v47, %v721_v6  ;;  %v738_v40 = vsub.f32 %v3719_v51, %v721_v6  ;;  %v739_v42 = vsub.f32 %v3717_v48, %v721_v6 }
 0x207   : > { %v730_v7 = vpop.xlane.xlu0 %729  ;;  %v740_v43 = vsub.f32 %v711_v61, %v721_v6  ;;  %v837_v47 = vrot.slane %v832_v35, %v3712_v37  ;;  %v851_v51 = vrot.slane %v846_v36, %v3712_v37  ;;  %v844_v48 = vrot.slane %v839_v39, %v3712_v37 }
 0x208   : > { %v731_v9 = vmul.f32 0.001953125, %v730_v7 }
 0x20a   : > { %v733_v10 = vsub.f32 %v731_v9, %v732_v8 }
 0x20c   : > { %v734_v11 = vmax.f32 %v733_v10, 0.0 }
 0x20e   : > { %v735_v13 = vadd.f32 1e-05, %v734_v11 }
 0x210   : > { %2986 = vrsqrt.f32 %v735_v13 }
 0x21d   : > { %v2987_v44 = vpop.eup %2986 }
 0x21e   : > { %v741_v52 = vmul.f32 %v2987_v44, %v737_v38  ;;  %v742_v53 = vmul.f32 %v2987_v44, %v738_v40  ;;  %v743_v54 = vmul.f32 %v2987_v44, %v739_v42  ;;  %v744_v55 = vmul.f32 %v2987_v44, %v740_v43 }
 0x220   : > { %v745_v57 = vpack.c.bf16 %v741_v52, %v741_v52  ;;  %v746_v58 = vpack.c.bf16 %v742_v53, %v742_v53  ;;  %v747_v59 = vpack.c.bf16 %v743_v54, %v743_v54  ;;  %v748_v60 = vpack.c.bf16 %v744_v55, %v744_v55 }
 0x222   : > { %v802_v61 = vmul.bf16 %v780_v45, %v745_v57  ;;  %v803_v62 = vmul.bf16 %v787_v49, %v746_v58  ;;  %v804_v63 = vmul.bf16 %v794_v46, %v747_v59  ;;  %v805_v0 = vmul.bf16 %v801_v50, %v748_v60 }
 0x224   : > { %v859_v1 = vadd.bf16 %v837_v47, %v802_v61  ;;  %v860_v3 = vadd.bf16 %v844_v48, %v803_v62  ;;  %v861_v4 = vadd.bf16 %v851_v51, %v804_v63  ;;  %v862_v5 = vadd.bf16 %v858_v56, %v805_v0 }
 0x226   : > { %v863_v6 = vmax.bf16 %v3492_v2, %v859_v1  ;;  %v864_v7 = vmax.bf16 %v3492_v2, %v860_v3  ;;  %v865_v8 = vmax.bf16 %v3492_v2, %v861_v4  ;;  %v866_v37 = vmax.bf16 %v3492_v2, %v862_v5 }
 0x228   : > { %v2600_v9 = vcombine.low %v863_v6, %v864_v7  ;;  %v2601_v10 = vcombine.low %v865_v8, %v866_v37 }
 0x22a   : > { %879 = vst [vmem:[#allocation2] sm:$0xff] %v2600_v9  ;;  %880 = vst [vmem:[#allocation2 + $0x8] sm:$0xff] %v2601_v10 }
 0x22b PF: > { %v2988_v11 = vld [vmem:[%s3681_s6 + $0xe4] ss:$16 sps:$4 sm:$0xff]   ;;  %v2992_v2 = vld [vmem:[%s3681_s6 + $0xe0] ss:$16 sps:$4 sm:$0xff]   ;;  %p2736_p6 = scmp.ne.s32.totalorder %s3472_s27, 2 }
 0x22c   : > { %v2990_v12 = vld [vmem:[%s3681_s6 + $0x2e4] ss:$16 sps:$4 sm:$0xff]   ;;  %1705 = vmatprep.subr.bf16.mxu0 %v2988_v11  ;;  %v2993_v13 = vld [vmem:[%s3681_s6 + $0x2e0] ss:$16 sps:$4 sm:$0xff]  }
 0x22d   : > { %1746 = vmatprep.subr.bf16.mxu1 %v2990_v12  ;;  %v2994_v14 = vld [vmem:[%s3681_s6 + $0xc4] ss:$16 sps:$4 sm:$0xff]   ;;  %1706 = vmatpush1.bf16.msra.mxu0 %v2992_v2  ;;  %v2998_v16 = vld [vmem:[%s3681_s6 + $0xc0] ss:$16 sps:$4 sm:$0xff]  }
 0x22e   : > { %1747 = vmatpush1.bf16.msra.mxu1 %v2993_v13  ;;  %v2996_v15 = vld [vmem:[%s3681_s6 + $0x2c4] ss:$16 sps:$4 sm:$0xff]   ;;  %1707 = vmatprep.subr.bf16.mxu0 %v2994_v14  ;;  %v2999_v17 = vld [vmem:[%s3681_s6 + $0x2c0] ss:$16 sps:$4 sm:$0xff]   ;;  %v3090_v14 = vld [vmem:[%s3681_s6 + $0xec] ss:$16 sps:$4 sm:$0xff]  }
 0x22f   : > { %1748 = vmatprep.subr.bf16.mxu1 %v2996_v15  ;;  %v3000_v18 = vld [vmem:[%s3681_s6 + $0xa4] ss:$16 sps:$4 sm:$0xff]   ;;  %v3004_v20 = vld [vmem:[%s3681_s6 + $0xa0] ss:$16 sps:$4 sm:$0xff]   ;;  %v3093_v15 = vld [vmem:[%s3681_s6 + $0x2ec] ss:$16 sps:$4 sm:$0xff]  }
 0x230   : > { %v3002_v19 = vld [vmem:[%s3681_s6 + $0x2a4] ss:$16 sps:$4 sm:$0xff]   ;;  %v3005_v21 = vld [vmem:[%s3681_s6 + $0x2a0] ss:$16 sps:$4 sm:$0xff]  }
 0x231   : > { %1708 = vmatpush1.bf16.msra.mxu0 %v2998_v16  ;;  %v3006_v22 = vld [vmem:[%s3681_s6 + $0x84] ss:$16 sps:$4 sm:$0xff]   ;;  %v3010_v24 = vld [vmem:[%s3681_s6 + $0x80] ss:$16 sps:$4 sm:$0xff]   ;;  %v884_v59 = vld [vmem:[#allocation2 + $0x8] sm:$0xff] }
 0x232   : > { %1749 = vmatpush1.bf16.msra.mxu1 %v2999_v17  ;;  %1709 = vmatprep.subr.bf16.mxu0 %v3000_v18  ;;  %v3008_v23 = vld [vmem:[%s3681_s6 + $0x284] ss:$16 sps:$4 sm:$0xff]   ;;  %v3011_v25 = vld [vmem:[%s3681_s6 + $0x280] ss:$16 sps:$4 sm:$0xff]   ;;  %v2605_v62 = vcombine.high %v884_v59, %v884_v59  ;;  %v3818_v17 = vcombine.low %v884_v59, %v884_v59  ;;  %v3088_v18 = vld [vmem:[%s3681_s6 + $0xe8] ss:$16 sps:$4 sm:$0xff]  }
 0x233   : > { %1750 = vmatprep.subr.bf16.mxu1 %v3002_v19  ;;  %v3012_v26 = vld [vmem:[%s3681_s6 + $0x64] ss:$16 sps:$4 sm:$0xff]   ;;  %v3016_v28 = vld [vmem:[%s3681_s6 + $0x60] ss:$16 sps:$4 sm:$0xff]   ;;  %v3091_v19 = vld [vmem:[%s3681_s6 + $0x2e8] ss:$16 sps:$4 sm:$0xff]  }
 0x234   : > { %v3014_v27 = vld [vmem:[%s3681_s6 + $0x264] ss:$16 sps:$4 sm:$0xff]   ;;  %v3017_v29 = vld [vmem:[%s3681_s6 + $0x260] ss:$16 sps:$4 sm:$0xff]   ;;  %1778 = vmatprep.mubr.bf16.mxu1 %v2605_v62  ;;  %v3148_v59 = vld [vmem:[%s3681_s6 + $0x1a8] ss:$16 sps:$4 sm:$0xff]  }
 0x235   : > { %1710 = vmatpush1.bf16.msra.mxu0 %v3004_v20  ;;  %v3018_v30 = vld [vmem:[%s3681_s6 + $0x44] ss:$16 sps:$4 sm:$0xff]   ;;  %v3022_v32 = vld [vmem:[%s3681_s6 + $0x40] ss:$16 sps:$4 sm:$0xff]   ;;  %v3096_v20 = vld [vmem:[%s3681_s6 + $0xcc] ss:$16 sps:$4 sm:$0xff]  }
 0x236   : > { %1751 = vmatpush1.bf16.msra.mxu1 %v3005_v21  ;;  %1711 = vmatprep.subr.bf16.mxu0 %v3006_v22  ;;  %v3020_v31 = vld [vmem:[%s3681_s6 + $0x244] ss:$16 sps:$4 sm:$0xff]   ;;  %v3023_v33 = vld [vmem:[%s3681_s6 + $0x240] ss:$16 sps:$4 sm:$0xff]   ;;  %v3099_v21 = vld [vmem:[%s3681_s6 + $0x2cc] ss:$16 sps:$4 sm:$0xff]  }
 0x237   : > { %1752 = vmatprep.subr.bf16.mxu1 %v3008_v23  ;;  %v3024_v34 = vld [vmem:[%s3681_s6 + $0x24] ss:$16 sps:$4 sm:$0xff]   ;;  %v3028_v36 = vld [vmem:[%s3681_s6 + $0x20] ss:$16 sps:$4 sm:$0xff]   ;;  %v3094_v22 = vld [vmem:[%s3681_s6 + $0xc8] ss:$16 sps:$4 sm:$0xff]  }
 0x238   : > { %v3026_v35 = vld [vmem:[%s3681_s6 + $0x224] ss:$16 sps:$4 sm:$0xff]   ;;  %v3029_v39 = vld [vmem:[%s3681_s6 + $0x220] ss:$16 sps:$4 sm:$0xff]   ;;  %v3097_v23 = vld [vmem:[%s3681_s6 + $0x2c8] ss:$16 sps:$4 sm:$0xff]  }
 0x239   : > { %1712 = vmatpush1.bf16.msra.mxu0 %v3010_v24  ;;  %v3030_v41 = vld [vmem:[%s3681_s6 + $0x4] ss:$16 sps:$4 sm:$0xff]   ;;  %v3034_v40 = vld [vmem:[%s3681_s6] ss:$16 sps:$4 sm:$0xff]   ;;  %v3102_v24 = vld [vmem:[%s3681_s6 + $0xac] ss:$16 sps:$4 sm:$0xff]  }
 0x23a   : > { %1753 = vmatpush1.bf16.msra.mxu1 %v3011_v25  ;;  %1713 = vmatprep.subr.bf16.mxu0 %v3012_v26  ;;  %v3032_v38 = vld [vmem:[%s3681_s6 + $0x204] ss:$16 sps:$4 sm:$0xff]   ;;  %v3035_v42 = vld [vmem:[%s3681_s6 + $0x200] ss:$16 sps:$4 sm:$0xff]   ;;  %v3105_v25 = vld [vmem:[%s3681_s6 + $0x2ac] ss:$16 sps:$4 sm:$0xff]  }
 0x23b   : > { %1754 = vmatprep.subr.bf16.mxu1 %v3014_v27  ;;  %v3036_v43 = vld [vmem:[%s3681_s6 + $0x1e4] ss:$16 sps:$4 sm:$0xff]   ;;  %v3040_v45 = vld [vmem:[%s3681_s6 + $0x1e0] ss:$16 sps:$4 sm:$0xff]   ;;  %v3100_v26 = vld [vmem:[%s3681_s6 + $0xa8] ss:$16 sps:$4 sm:$0xff]  }
 0x23c   : > { %v3038_v44 = vld [vmem:[%s3681_s6 + $0x3e4] ss:$16 sps:$4 sm:$0xff]   ;;  %v3041_v46 = vld [vmem:[%s3681_s6 + $0x3e0] ss:$16 sps:$4 sm:$0xff]   ;;  %v3103_v27 = vld [vmem:[%s3681_s6 + $0x2a8] ss:$16 sps:$4 sm:$0xff]  }
 0x23d   : > { %1714 = vmatpush1.bf16.msra.mxu0 %v3016_v28  ;;  %v3042_v49 = vld [vmem:[%s3681_s6 + $0x1c4] ss:$16 sps:$4 sm:$0xff]   ;;  %v3046_v52 = vld [vmem:[%s3681_s6 + $0x1c0] ss:$16 sps:$4 sm:$0xff]   ;;  %v3108_v28 = vld [vmem:[%s3681_s6 + $0x8c] ss:$16 sps:$4 sm:$0xff]  }
 0x23e   : > { %1755 = vmatpush1.bf16.msra.mxu1 %v3017_v29  ;;  %1715 = vmatprep.subr.bf16.mxu0 %v3018_v30  ;;  %v3044_v50 = vld [vmem:[%s3681_s6 + $0x3c4] ss:$16 sps:$4 sm:$0xff]   ;;  %v3047_v53 = vld [vmem:[%s3681_s6 + $0x3c0] ss:$16 sps:$4 sm:$0xff]   ;;  %v3111_v29 = vld [vmem:[%s3681_s6 + $0x28c] ss:$16 sps:$4 sm:$0xff]  }
 0x23f   : > { %1756 = vmatprep.subr.bf16.mxu1 %v3020_v31  ;;  %v3048_v54 = vld [vmem:[%s3681_s6 + $0x1a4] ss:$16 sps:$4 sm:$0xff]   ;;  %v3052_v47 = vld [vmem:[%s3681_s6 + $0x1a0] ss:$16 sps:$4 sm:$0xff]   ;;  %v3106_v30 = vld [vmem:[%s3681_s6 + $0x88] ss:$16 sps:$4 sm:$0xff]  }
 0x240   : > { %v3050_v55 = vld [vmem:[%s3681_s6 + $0x3a4] ss:$16 sps:$4 sm:$0xff]   ;;  %v3053_v51 = vld [vmem:[%s3681_s6 + $0x3a0] ss:$16 sps:$4 sm:$0xff]   ;;  %v3109_v31 = vld [vmem:[%s3681_s6 + $0x288] ss:$16 sps:$4 sm:$0xff]  }
 0x241   : > { %1716 = vmatpush1.bf16.msra.mxu0 %v3022_v32  ;;  %v3054_v48 = vld [vmem:[%s3681_s6 + $0x184] ss:$16 sps:$4 sm:$0xff]   ;;  %v3058_v60 = vld [vmem:[%s3681_s6 + $0x180] ss:$16 sps:$4 sm:$0xff]   ;;  %v3114_v32 = vld [vmem:[%s3681_s6 + $0x6c] ss:$16 sps:$4 sm:$0xff]  }
 0x242   : > { %1757 = vmatpush1.bf16.msra.mxu1 %v3023_v33  ;;  %1717 = vmatprep.subr.bf16.mxu0 %v3024_v34  ;;  %v3056_v56 = vld [vmem:[%s3681_s6 + $0x384] ss:$16 sps:$4 sm:$0xff]   ;;  %v3059_v61 = vld [vmem:[%s3681_s6 + $0x380] ss:$16 sps:$4 sm:$0xff]   ;;  %v3117_v33 = vld [vmem:[%s3681_s6 + $0x26c] ss:$16 sps:$4 sm:$0xff]  }
 0x243   : > { %1758 = vmatprep.subr.bf16.mxu1 %v3026_v35  ;;  %v883_v57 = vld [vmem:[#allocation2] sm:$0xff]  ;;  %v3112_v34 = vld [vmem:[%s3681_s6 + $0x68] ss:$16 sps:$4 sm:$0xff]  }
 0x244   : > { %v3793_v58 = vcombine.high %v883_v57, %v883_v57  ;;  %v3060_v63 = vld [vmem:[%s3681_s6 + $0x164] ss:$16 sps:$4 sm:$0xff]   ;;  %v3064_v1 = vld [vmem:[%s3681_s6 + $0x160] ss:$16 sps:$4 sm:$0xff]   ;;  %v3816_v16 = vcombine.low %v883_v57, %v883_v57  ;;  %v3115_v35 = vld [vmem:[%s3681_s6 + $0x268] ss:$16 sps:$4 sm:$0xff]  }
 0x245   : > { %1718 = vmatpush1.bf16.msra.mxu0 %v3028_v36  ;;  %v3062_v0 = vld [vmem:[%s3681_s6 + $0x364] ss:$16 sps:$4 sm:$0xff]   ;;  %v3065_v3 = vld [vmem:[%s3681_s6 + $0x360] ss:$16 sps:$4 sm:$0xff]   ;;  %v3120_v36 = vld [vmem:[%s3681_s6 + $0x4c] ss:$16 sps:$4 sm:$0xff]  }
 0x246   : > { %1759 = vmatpush1.bf16.msra.mxu1 %v3029_v39  ;;  %1719 = vmatprep.subr.bf16.mxu0 %v3030_v41  ;;  %v3066_v4 = vld [vmem:[%s3681_s6 + $0x144] ss:$16 sps:$4 sm:$0xff]   ;;  %v3070_v6 = vld [vmem:[%s3681_s6 + $0x140] ss:$16 sps:$4 sm:$0xff]   ;;  %v3123_v39 = vld [vmem:[%s3681_s6 + $0x24c] ss:$16 sps:$4 sm:$0xff]  }
 0x247   : > { %1760 = vmatprep.subr.bf16.mxu1 %v3032_v38  ;;  %1737 = vmatprep.mubr.bf16.mxu0 %v3793_v58  ;;  %v3068_v5 = vld [vmem:[%s3681_s6 + $0x344] ss:$16 sps:$4 sm:$0xff]   ;;  %v3071_v7 = vld [vmem:[%s3681_s6 + $0x340] ss:$16 sps:$4 sm:$0xff]   ;;  %v3118_v41 = vld [vmem:[%s3681_s6 + $0x48] ss:$16 sps:$4 sm:$0xff]  }
 0x248   : > { %v3072_v8 = vld [vmem:[%s3681_s6 + $0x124] ss:$16 sps:$4 sm:$0xff]   ;;  %v3076_v9 = vld [vmem:[%s3681_s6 + $0x120] ss:$16 sps:$4 sm:$0xff]   ;;  %v3121_v38 = vld [vmem:[%s3681_s6 + $0x248] ss:$16 sps:$4 sm:$0xff]  }
 0x249   : > { %1720 = vmatpush1.bf16.msra.mxu0 %v3034_v40  ;;  %v3074_v37 = vld [vmem:[%s3681_s6 + $0x324] ss:$16 sps:$4 sm:$0xff]   ;;  %v3077_v10 = vld [vmem:[%s3681_s6 + $0x320] ss:$16 sps:$4 sm:$0xff]   ;;  %v3126_v40 = vld [vmem:[%s3681_s6 + $0x2c] ss:$16 sps:$4 sm:$0xff]  }
 0x24a   : > { %1761 = vmatpush1.bf16.msra.mxu1 %v3035_v42  ;;  %1721 = vmatprep.subr.bf16.mxu0 %v3036_v43  ;;  %v3078_v11 = vld [vmem:[%s3681_s6 + $0x104] ss:$16 sps:$4 sm:$0xff]   ;;  %v3082_v2 = vld [vmem:[%s3681_s6 + $0x100] ss:$16 sps:$4 sm:$0xff]   ;;  %v3129_v42 = vld [vmem:[%s3681_s6 + $0x22c] ss:$16 sps:$4 sm:$0xff]  }
 0x24b   : > { %1762 = vmatprep.subr.bf16.mxu1 %v3038_v44  ;;  %v3080_v12 = vld [vmem:[%s3681_s6 + $0x304] ss:$16 sps:$4 sm:$0xff]   ;;  %v3083_v13 = vld [vmem:[%s3681_s6 + $0x300] ss:$16 sps:$4 sm:$0xff]   ;;  %v3124_v43 = vld [vmem:[%s3681_s6 + $0x28] ss:$16 sps:$4 sm:$0xff]  }
 0x24c   : > { %v3127_v44 = vld [vmem:[%s3681_s6 + $0x228] ss:$16 sps:$4 sm:$0xff]   ;;  %v3150_v57 = vld [vmem:[%s3681_s6 + $0x1ac] ss:$16 sps:$4 sm:$0xff]  }
 0x24d   : > { %1722 = vmatpush2.bf16.msra.mxu0 %v3040_v45  ;;  %v3132_v45 = vld [vmem:[%s3681_s6 + $0xc] ss:$16 sps:$4 sm:$0xff]  }
 0x24e   : > { %1763 = vmatpush2.bf16.msra.mxu1 %v3041_v46  ;;  %1723 = vmatprep.subr.bf16.mxu0 %v3042_v49  ;;  %v3135_v46 = vld [vmem:[%s3681_s6 + $0x20c] ss:$16 sps:$4 sm:$0xff]   ;;  %v3130_v49 = vld [vmem:[%s3681_s6 + $0x8] ss:$16 sps:$4 sm:$0xff]  }
 0x24f   : > { %1764 = vmatprep.subr.bf16.mxu1 %v3044_v50  ;;  %v3133_v50 = vld [vmem:[%s3681_s6 + $0x208] ss:$16 sps:$4 sm:$0xff]  }
 0x251   : > { %1724 = vmatpush2.bf16.msra.mxu0 %v3046_v52  ;;  %v3138_v52 = vld [vmem:[%s3681_s6 + $0x1ec] ss:$16 sps:$4 sm:$0xff]  }
 0x252   : > { %1765 = vmatpush2.bf16.msra.mxu1 %v3047_v53  ;;  %1725 = vmatprep.subr.bf16.mxu0 %v3048_v54  ;;  %v3141_v53 = vld [vmem:[%s3681_s6 + $0x3ec] ss:$16 sps:$4 sm:$0xff]   ;;  %v3136_v54 = vld [vmem:[%s3681_s6 + $0x1e8] ss:$16 sps:$4 sm:$0xff]  }
 0x253   : > { %1766 = vmatprep.subr.bf16.mxu1 %v3050_v55  ;;  %v3139_v55 = vld [vmem:[%s3681_s6 + $0x3e8] ss:$16 sps:$4 sm:$0xff]  }
 0x255   : > { %1726 = vmatpush2.bf16.msra.mxu0 %v3052_v47  ;;  %v3144_v47 = vld [vmem:[%s3681_s6 + $0x1cc] ss:$16 sps:$4 sm:$0xff]  }
 0x256   : > { %1767 = vmatpush2.bf16.msra.mxu1 %v3053_v51  ;;  %1727 = vmatprep.subr.bf16.mxu0 %v3054_v48  ;;  %v3147_v51 = vld [vmem:[%s3681_s6 + $0x3cc] ss:$16 sps:$4 sm:$0xff]   ;;  %v3142_v48 = vld [vmem:[%s3681_s6 + $0x1c8] ss:$16 sps:$4 sm:$0xff]  }
 0x257   : > { %1768 = vmatprep.subr.bf16.mxu1 %v3056_v56  ;;  %v3145_v56 = vld [vmem:[%s3681_s6 + $0x3c8] ss:$16 sps:$4 sm:$0xff]  }
 0x259   : > { %1728 = vmatpush2.bf16.msra.mxu0 %v3058_v60  ;;  %v3151_v60 = vld [vmem:[%s3681_s6 + $0x3a8] ss:$16 sps:$4 sm:$0xff]  }
 0x25a   : > { %1769 = vmatpush2.bf16.msra.mxu1 %v3059_v61  ;;  %1729 = vmatprep.subr.bf16.mxu0 %v3060_v63  ;;  %v3156_v61 = vld [vmem:[%s3681_s6 + $0x18c] ss:$16 sps:$4 sm:$0xff]   ;;  %v3154_v63 = vld [vmem:[%s3681_s6 + $0x188] ss:$16 sps:$4 sm:$0xff]  }
 0x25b   : > { %1770 = vmatprep.subr.bf16.mxu1 %v3062_v0  ;;  %v3157_v0 = vld [vmem:[%s3681_s6 + $0x388] ss:$16 sps:$4 sm:$0xff]  }
 0x25d   : > { %1730 = vmatpush2.bf16.msra.mxu0 %v3064_v1  ;;  %v3162_v1 = vld [vmem:[%s3681_s6 + $0x16c] ss:$16 sps:$4 sm:$0xff]  }
 0x25e   : > { %1771 = vmatpush2.bf16.msra.mxu1 %v3065_v3  ;;  %1731 = vmatprep.subr.bf16.mxu0 %v3066_v4  ;;  %v3165_v3 = vld [vmem:[%s3681_s6 + $0x36c] ss:$16 sps:$4 sm:$0xff]   ;;  %v3160_v4 = vld [vmem:[%s3681_s6 + $0x168] ss:$16 sps:$4 sm:$0xff]  }
 0x25f   : > { %1772 = vmatprep.subr.bf16.mxu1 %v3068_v5  ;;  %v3163_v5 = vld [vmem:[%s3681_s6 + $0x368] ss:$16 sps:$4 sm:$0xff]  }
 0x261   : > { %1732 = vmatpush2.bf16.msra.mxu0 %v3070_v6  ;;  %v3168_v6 = vld [vmem:[%s3681_s6 + $0x14c] ss:$16 sps:$4 sm:$0xff]  }
 0x262   : > { %1773 = vmatpush2.bf16.msra.mxu1 %v3071_v7  ;;  %1733 = vmatprep.subr.bf16.mxu0 %v3072_v8  ;;  %v3171_v7 = vld [vmem:[%s3681_s6 + $0x34c] ss:$16 sps:$4 sm:$0xff]   ;;  %v3166_v8 = vld [vmem:[%s3681_s6 + $0x148] ss:$16 sps:$4 sm:$0xff]  }
 0x263   : > { %1774 = vmatprep.subr.bf16.mxu1 %v3074_v37  ;;  %v3169_v37 = vld [vmem:[%s3681_s6 + $0x348] ss:$16 sps:$4 sm:$0xff]  }
 0x265   : > { %1734 = vmatpush2.bf16.msra.mxu0 %v3076_v9  ;;  %v3174_v9 = vld [vmem:[%s3681_s6 + $0x12c] ss:$16 sps:$4 sm:$0xff]  }
 0x266   : > { %1775 = vmatpush2.bf16.msra.mxu1 %v3077_v10  ;;  %1735 = vmatprep.subr.bf16.mxu0 %v3078_v11  ;;  %v3177_v10 = vld [vmem:[%s3681_s6 + $0x32c] ss:$16 sps:$4 sm:$0xff]   ;;  %v3172_v11 = vld [vmem:[%s3681_s6 + $0x128] ss:$16 sps:$4 sm:$0xff]  }
 0x267   : > { %1776 = vmatprep.subr.bf16.mxu1 %v3080_v12  ;;  %v3175_v12 = vld [vmem:[%s3681_s6 + $0x328] ss:$16 sps:$4 sm:$0xff]  }
 0x269   : > { %1736 = vmatpush2.bf16.msra.mxu0 %v3082_v2  ;;  %v3180_v2 = vld [vmem:[%s3681_s6 + $0x10c] ss:$16 sps:$4 sm:$0xff]  }
 0x26a   : > { %1777 = vmatpush2.bf16.msra.mxu1 %v3083_v13  ;;  %1787 = vmatprep.subr.bf16.mxu0 %v3090_v14  ;;  %v3183_v13 = vld [vmem:[%s3681_s6 + $0x30c] ss:$16 sps:$4 sm:$0xff]   ;;  %v3178_v14 = vld [vmem:[%s3681_s6 + $0x108] ss:$16 sps:$4 sm:$0xff]  }
 0x26b   : > { %1828 = vmatprep.subr.bf16.mxu1 %v3093_v15  ;;  %v3181_v15 = vld [vmem:[%s3681_s6 + $0x308] ss:$16 sps:$4 sm:$0xff]  }
 0x26c   : > { %1738 = vmatmul.mubr.bf16.vlgmr.msra.gmra.mxu0 %v3816_v16 }
 0x26d   : > { %1779 = vmatmul.mubr.bf16.vlgmr.msra.gmra.mxu1 %v3818_v17  ;;  %1788 = vmatpush1.bf16.msra.mxu0 %v3088_v18 }
 0x26e   : > { %1829 = vmatpush1.bf16.msra.mxu1 %v3091_v19  ;;  %1789 = vmatprep.subr.bf16.mxu0 %v3096_v20 }
 0x26f   : > { %1830 = vmatprep.subr.bf16.mxu1 %v3099_v21  ;;  %1819 = vmatprep.mubr.bf16.mxu0 %v3793_v58  ;;  %v3153_v58 = vld [vmem:[%s3681_s6 + $0x3ac] ss:$16 sps:$4 sm:$0xff]  }
 0x270   : > { %1860 = vmatprep.mubr.bf16.mxu1 %v2605_v62  ;;  %v3159_v62 = vld [vmem:[%s3681_s6 + $0x38c] ss:$16 sps:$4 sm:$0xff]  }
 0x271   : > { %1790 = vmatpush1.bf16.msra.mxu0 %v3094_v22 }
 0x272   : > { %1831 = vmatpush1.bf16.msra.mxu1 %v3097_v23  ;;  %1791 = vmatprep.subr.bf16.mxu0 %v3102_v24 }
 0x273   : > { %1832 = vmatprep.subr.bf16.mxu1 %v3105_v25 }
 0x275   : > { %1792 = vmatpush1.bf16.msra.mxu0 %v3100_v26  ;;  %v1015_v26 = vlaneseq }
 0x276   : > { %1833 = vmatpush1.bf16.msra.mxu1 %v3103_v27  ;;  %1793 = vmatprep.subr.bf16.mxu0 %v3108_v28 }
 0x277   : > { %1834 = vmatprep.subr.bf16.mxu1 %v3111_v29  ;;  %v3887_v27 = vshrl.u32 %v1015_v26, 7 }
 0x279   : > { %1794 = vmatpush1.bf16.msra.mxu0 %v3106_v30  ;;  %v3890_v28 = vsub.s32 0, %v3887_v27  ;;  %v1021_v29 = vsub.s32 4, %v3887_v27 }
 0x27a   : > { %1835 = vmatpush1.bf16.msra.mxu1 %v3109_v31  ;;  %1795 = vmatprep.subr.bf16.mxu0 %v3114_v32 }
 0x27b   : > { %1836 = vmatprep.subr.bf16.mxu1 %v3117_v33  ;;  %v882_v33 = vld [vmem:[%s365_s12 + $0x8] sm:$0x77] }
 0x27d   : > { %1796 = vmatpush1.bf16.msra.mxu0 %v3112_v34 }
 0x27e   : > { %1837 = vmatpush1.bf16.msra.mxu1 %v3115_v35  ;;  %1797 = vmatprep.subr.bf16.mxu0 %v3120_v36  ;;  %v1026_v36 = vrot.slane %v882_v33, %v3890_v28 }
 0x27f   : > { %1838 = vmatprep.subr.bf16.mxu1 %v3123_v39  ;;  %v1030_v39 = vrot.slane %v882_v33, %v1021_v29 }
 0x281   : > { %1798 = vmatpush1.bf16.msra.mxu0 %v3118_v41 }
 0x282   : > { %1839 = vmatpush1.bf16.msra.mxu1 %v3121_v38  ;;  %1799 = vmatprep.subr.bf16.mxu0 %v3126_v40  ;;  %v1046_v40 = vrot.slane %v1026_v36, %v3890_v28 }
 0x283   : > { %1840 = vmatprep.subr.bf16.mxu1 %v3129_v42  ;;  %v1050_v42 = vrot.slane %v1030_v39, %v3890_v28 }
 0x285   : > { %1800 = vmatpush1.bf16.msra.mxu0 %v3124_v43 }
 0x286   : > { %1841 = vmatpush1.bf16.msra.mxu1 %v3127_v44  ;;  %1801 = vmatprep.subr.bf16.mxu0 %v3132_v45 }
 0x287   : > { %1842 = vmatprep.subr.bf16.mxu1 %v3135_v46 }
 0x289   : > { %1802 = vmatpush1.bf16.msra.mxu0 %v3130_v49 }
 0x28a   : > { %1843 = vmatpush1.bf16.msra.mxu1 %v3133_v50  ;;  %1803 = vmatprep.subr.bf16.mxu0 %v3138_v52 }
 0x28b   : > { %1844 = vmatprep.subr.bf16.mxu1 %v3141_v53 }
 0x28d   : > { %1804 = vmatpush2.bf16.msra.mxu0 %v3136_v54 }
 0x28e   : > { %1845 = vmatpush2.bf16.msra.mxu1 %v3139_v55  ;;  %1805 = vmatprep.subr.bf16.mxu0 %v3144_v47 }
 0x28f   : > { %1846 = vmatprep.subr.bf16.mxu1 %v3147_v51 }
 0x291   : > { %1806 = vmatpush2.bf16.msra.mxu0 %v3142_v48 }
 0x292   : > { %1847 = vmatpush2.bf16.msra.mxu1 %v3145_v56  ;;  %1807 = vmatprep.subr.bf16.mxu0 %v3150_v57 }
 0x293   : > { %1848 = vmatprep.subr.bf16.mxu1 %v3153_v58 }
 0x295   : > { %1808 = vmatpush2.bf16.msra.mxu0 %v3148_v59 }
 0x296   : > { %1849 = vmatpush2.bf16.msra.mxu1 %v3151_v60  ;;  %1809 = vmatprep.subr.bf16.mxu0 %v3156_v61 }
 0x297   : > { %1850 = vmatprep.subr.bf16.mxu1 %v3159_v62 }
 0x299   : > { %1810 = vmatpush2.bf16.msra.mxu0 %v3154_v63 }
 0x29a   : > { %1851 = vmatpush2.bf16.msra.mxu1 %v3157_v0  ;;  %1811 = vmatprep.subr.bf16.mxu0 %v3162_v1 }
 0x29b   : > { %1852 = vmatprep.subr.bf16.mxu1 %v3165_v3 }
 0x29d   : > { %1812 = vmatpush2.bf16.msra.mxu0 %v3160_v4 }
 0x29e   : > { %1853 = vmatpush2.bf16.msra.mxu1 %v3163_v5  ;;  %1813 = vmatprep.subr.bf16.mxu0 %v3168_v6 }
 0x29f   : > { %1854 = vmatprep.subr.bf16.mxu1 %v3171_v7  ;;  %v1905_v7 = vsub.s32 1, %v3887_v27 }
 0x2a1   : > { %1814 = vmatpush2.bf16.msra.mxu0 %v3166_v8  ;;  %v1909_v8 = vsub.s32 5, %v3887_v27 }
 0x2a2   : > { %1855 = vmatpush2.bf16.msra.mxu1 %v3169_v37  ;;  %1815 = vmatprep.subr.bf16.mxu0 %v3174_v9 }
 0x2a3   : > { %1856 = vmatprep.subr.bf16.mxu1 %v3177_v10 }
 0x2a5   : > { %1816 = vmatpush2.bf16.msra.mxu0 %v3172_v11 }
 0x2a6   : > { %1857 = vmatpush2.bf16.msra.mxu1 %v3175_v12  ;;  %1817 = vmatprep.subr.bf16.mxu0 %v3180_v2  ;;  %v1914_v12 = vrot.slane %v882_v33, %v1905_v7  ;;  %v1918_v2 = vrot.slane %v882_v33, %v1909_v8 }
 0x2a7   : > { %1858 = vmatprep.subr.bf16.mxu1 %v3183_v13 }
 0x2a9   : > { %1818 = vmatpush2.bf16.msra.mxu0 %v3178_v14  ;;  %v1965_v14 = vsub.s32 2, %v3887_v27 }
 0x2aa   : > { %1859 = vmatpush2.bf16.msra.mxu1 %v3181_v15  ;;  %v1969_v15 = vsub.s32 6, %v3887_v27 }
 0x2ac   : > { %1820 = vmatmul.mubr.bf16.vlgmr.msra.gmra.mxu0 %v3816_v16  ;;  %v881_v16 = vld [vmem:[%s365_s12] sm:$0x77] }
 0x2ad   : > { %1861 = vmatmul.mubr.bf16.vlgmr.msra.gmra.mxu1 %v3818_v17  ;;  %v1018_v17 = vrot.slane %v881_v16, %v3890_v28  ;;  %v1022_v30 = vrot.slane %v881_v16, %v1021_v29  ;;  %v1906_v10 = vrot.slane %v881_v16, %v1905_v7  ;;  %v1910_v11 = vrot.slane %v881_v16, %v1909_v8 }
 0x2ae   : > { %v3493_v8 = vmov 0  }
 0x2af   : > { %v1038_v31 = vrot.slane %v1018_v17, %v3890_v28  ;;  %v1042_v32 = vrot.slane %v1022_v30, %v3890_v28 }
 0x32c   : > { %v1739_v18 = vpop.f32.mrf.mxu0 }
 0x32d   : > { %v1780_v19 = vpop.f32.mrf.mxu1  ;;  %v1740_v34 = vadd.f32 %v1739_v18, %v1038_v31  ;;  %v1923_v18 = vpack.c.bf16 %v1906_v10, %v1906_v10 }
 0x32e   : > { %v1741_v20 = vpop.f32.mrf.mxu0 }
 0x32f   : > { %v1782_v21 = vpop.f32.mrf.mxu1  ;;  %v1742_v35 = vadd.f32 %v1741_v20, %v1042_v32  ;;  %v3901_v41 = vadd.f32 %v1780_v19, %v1740_v34  ;;  %v1924_v19 = vpack.c.bf16 %v1910_v11, %v1910_v11  ;;  %v1925_v20 = vpack.c.bf16 %v1914_v12, %v1914_v12 }
 0x330   : > { %v1743_v22 = vpop.f32.mrf.mxu0  ;;  %v1928_v26 = vshrl.u32 %v1923_v18, 16 }
 0x331   : > { %v1784_v23 = vpop.f32.mrf.mxu1  ;;  %v3903_v38 = vadd.f32 %v1782_v21, %v1742_v35  ;;  %v1876_v45 = vmul.f32 %v3901_v41, %v3901_v41  ;;  %v1926_v21 = vpack.c.bf16 %v1918_v2, %v1918_v2  ;;  %v1966_v22 = vrot.slane %v881_v16, %v1965_v14 }
 0x332   : > { %v1744_v24 = vpop.f32.mrf.mxu0  ;;  %v1970_v23 = vrot.slane %v881_v16, %v1969_v15  ;;  %v1936_v29 = vshrl.u32 %v1924_v19, 16  ;;  %v1944_v17 = vshrl.u32 %v1925_v20, 16  ;;  %v1929_v36 = vpack.i.b16 %v1928_v26, %v1928_v26 }
 0x333   : > { %v1785_v25 = vpop.f32.mrf.mxu1  ;;  %v1877_v46 = vmul.f32 %v3903_v38, %v3903_v38  ;;  %v1869_v55 = vadd.f32 %v3903_v38, %v3901_v41  ;;  %v1974_v24 = vrot.slane %v882_v33, %v1965_v14  ;;  %v1952_v30 = vshrl.u32 %v1926_v21, 16 }
 0x334   : > { %v1978_v25 = vrot.slane %v882_v33, %v1969_v15  ;;  %v1983_v31 = vpack.c.bf16 %v1966_v22, %v1966_v22  ;;  %v1984_v32 = vpack.c.bf16 %v1970_v23, %v1970_v23  ;;  %v1937_v39 = vpack.i.b16 %v1936_v29, %v1936_v29 }
 0x335   : > { %v1880_v58 = vadd.f32 %v1877_v46, %v1876_v45  ;;  %v1985_v34 = vpack.c.bf16 %v1974_v24, %v1974_v24  ;;  %v1945_v27 = vpack.i.b16 %v1944_v17, %v1944_v17 }
 0x336   : > { %v1986_v35 = vpack.c.bf16 %v1978_v25, %v1978_v25 }
 0x338   : > { %v2009_v45 = vpack.i.b16 %v1986_v35, %v1986_v35 }
 0x36c   : > { %v1821_v43 = vpop.f32.mrf.mxu0 }
 0x36d   : > { %v1862_v44 = vpop.f32.mrf.mxu1  ;;  %v1822_v49 = vadd.f32 %v1821_v43, %v1046_v40  ;;  %v1953_v40 = vpack.i.b16 %v1952_v30, %v1952_v30  ;;  %v1995_v43 = vpack.i.b16 %v1984_v32, %v1984_v32 }
 0x36e   : > { %v1823_v50 = vpop.f32.mrf.mxu0 }
 0x36f   : > { %v1864_v52 = vpop.f32.mrf.mxu1  ;;  %v3911_v53 = vadd.f32 %v1862_v44, %v1822_v49  ;;  %v1824_v54 = vadd.f32 %v1823_v50, %v1050_v42  ;;  %v1988_v42 = vpack.i.b16 %v1983_v31, %v1983_v31  ;;  %v2002_v44 = vpack.i.b16 %v1985_v34, %v1985_v34 }
 0x370   : > { %v1825_v47 = vpop.f32.mrf.mxu0 }
 0x371   : > { %v1866_v51 = vpop.f32.mrf.mxu1  ;;  %v1878_v48 = vmul.f32 %v3911_v53, %v3911_v53  ;;  %v3917_v56 = vadd.f32 %v1864_v52, %v1824_v54  ;;  %v1870_v57 = vadd.f32 %v1869_v55, %v3911_v53  ;;  %v1934_v52 = vrot.slane %v1929_v36, %v3890_v28 }
 0x372   : > { %v1826_v59 = vpop.f32.mrf.mxu0  ;;  %v1942_v54 = vrot.slane %v1937_v39, %v3890_v28  ;;  %v1950_v55 = vrot.slane %v1945_v27, %v3890_v28  ;;  %v1958_v47 = vrot.slane %v1953_v40, %v3890_v28 }
 0x373   : > { %v1867_v60 = vpop.f32.mrf.mxu1  ;;  %v1871_v61 = vadd.f32 %v1870_v57, %v3917_v56  ;;  %v1879_v62 = vmul.f32 %v3917_v56, %v3917_v56  ;;  %v1881_v63 = vadd.f32 %v1880_v58, %v1878_v48  ;;  %v2000_v59 = vrot.slane %v1995_v43, %v1905_v7 }
 0x374   : > { %v2014_v60 = vrot.slane %v2009_v45, %v1905_v7 }
 0x375   : > { %1872 = vadd.xlane.f32.xlu0 %v1871_v61  ;;  %v1882_v0 = vadd.f32 %v1881_v63, %v1879_v62 }
 0x379   : > { %1883 = vadd.xlane.f32.xlu0 %v1882_v0 }
 0x3fe   : > { %v1873_v1 = vpop.xlane.xlu0 %1872 }
 0x3ff   : > { %v1875_v3 = vmul.f32 0.001953125, %v1873_v1 }
 0x401   : > { %v1886_v5 = vmul.f32 %v1875_v3, %v1875_v3  ;;  %v1891_v16 = vsub.f32 %v3901_v41, %v1875_v3  ;;  %v1892_v33 = vsub.f32 %v3903_v38, %v1875_v3  ;;  %v1893_v46 = vsub.f32 %v3911_v53, %v1875_v3 }
 0x402   : > { %v1884_v4 = vpop.xlane.xlu0 %1883  ;;  %v1894_v49 = vsub.f32 %v3917_v56, %v1875_v3  ;;  %v1993_v41 = vrot.slane %v1988_v42, %v1905_v7  ;;  %v2007_v38 = vrot.slane %v2002_v44, %v1905_v7 }
 0x403   : > { %v1885_v6 = vmul.f32 0.001953125, %v1884_v4 }
 0x405   : > { %v1887_v37 = vsub.f32 %v1885_v6, %v1886_v5 }
 0x407   : > { %v1888_v9 = vmax.f32 %v1887_v37, 0.0 }
 0x409   : > { %v1889_v13 = vadd.f32 1e-05, %v1888_v9 }
 0x40b   : > { %3184 = vrsqrt.f32 %v1889_v13 }
 0x418   : > { %v3185_v50 = vpop.eup %3184 }
 0x419   : > { %v1895_v51 = vmul.f32 %v3185_v50, %v1891_v16  ;;  %v1896_v48 = vmul.f32 %v3185_v50, %v1892_v33  ;;  %v1897_v57 = vmul.f32 %v3185_v50, %v1893_v46  ;;  %v1898_v58 = vmul.f32 %v3185_v50, %v1894_v49 }
 0x41b   : > { %v1899_v53 = vpack.c.bf16 %v1895_v51, %v1895_v51  ;;  %v1900_v61 = vpack.c.bf16 %v1896_v48, %v1896_v48  ;;  %v1901_v56 = vpack.c.bf16 %v1897_v57, %v1897_v57  ;;  %v1902_v62 = vpack.c.bf16 %v1898_v58, %v1898_v58 }
 0x41d   : > { %v1959_v63 = vmul.bf16 %v1934_v52, %v1899_v53  ;;  %v1960_v0 = vmul.bf16 %v1942_v54, %v1900_v61  ;;  %v1961_v1 = vmul.bf16 %v1950_v55, %v1901_v56  ;;  %v1962_v3 = vmul.bf16 %v1958_v47, %v1902_v62 }
 0x41f   : > { %v2015_v4 = vadd.bf16 %v1993_v41, %v1959_v63  ;;  %v2016_v5 = vadd.bf16 %v2000_v59, %v1960_v0  ;;  %v2017_v6 = vadd.bf16 %v2007_v38, %v1961_v1  ;;  %v2018_v28 = vadd.bf16 %v2014_v60, %v1962_v3 }
 0x421   : > { %v2019_v37 = vmax.bf16 %v3493_v8, %v2015_v4  ;;  %v2020_v9 = vmax.bf16 %v3493_v8, %v2016_v5  ;;  %v2021_v10 = vmax.bf16 %v3493_v8, %v2017_v6  ;;  %v2022_v11 = vmax.bf16 %v3493_v8, %v2018_v28  ;;  %2040 = sbr.rel (%p2736_p6) target bundleno = 1298 (0x512), region = 80 }
 0x423   : > { %v2734_v12 = vcombine.low %v2019_v37, %v2020_v9  ;;  %v2735_v2 = vcombine.low %v2021_v10, %v2022_v11 }
 0x425   : > { %2035 = vst [vmem:[#allocation2] sm:$0xff] %v2734_v12  ;;  %2036 = vst [vmem:[#allocation2 + $0x8] sm:$0xff] %v2735_v2 }
 0x426   : > { %v3186_v7 = vld [vmem:[#allocation8 + $0x78] sm:$0xff]   ;;  %v3190_v18 = vld [vmem:[#allocation8 + $0x70] sm:$0xff]   ;;  %v3194_v22 = vld [vmem:[#allocation8 + $0x68] sm:$0xff]  }
 0x427   : > { %v3187_v13 = vld [vmem:[#allocation8 + $0xf8] sm:$0xff]   ;;  %2780 = vmatprep.subr.bf16.mxu0 %v3186_v7  ;;  %v3191_v19 = vld [vmem:[#allocation8 + $0xf0] sm:$0xff]   ;;  %v3195_v23 = vld [vmem:[#allocation8 + $0xe8] sm:$0xff]  }
 0x428   : > { %v3188_v14 = vld [vmem:[#allocation8 + $0x38] sm:$0xff]   ;;  %2802 = vmatprep.subr.bf16.mxu1 %v3187_v13  ;;  %v3192_v20 = vld [vmem:[#allocation8 + $0x30] sm:$0xff]   ;;  %v3196_v24 = vld [vmem:[#allocation8 + $0x28] sm:$0xff]  }
 0x429   : > { %v3189_v15 = vld [vmem:[#allocation8 + $0xb8] sm:$0xff]   ;;  %2781 = vmatpush3.bf16.msra.mxu0 %v3188_v14  ;;  %v3193_v21 = vld [vmem:[#allocation8 + $0xb0] sm:$0xff]   ;;  %v3197_v25 = vld [vmem:[#allocation8 + $0xa8] sm:$0xff]  }
 0x42a   : > { %2803 = vmatpush3.bf16.msra.mxu1 %v3189_v15  ;;  %2782 = vmatprep.subr.bf16.mxu0 %v3190_v18  ;;  %v3198_v26 = vld [vmem:[#allocation8 + $0x60] sm:$0xff]   ;;  %v3202_v31 = vld [vmem:[#allocation8 + $0x58] sm:$0xff]   ;;  %v3206_v36 = vld [vmem:[#allocation8 + $0x50] sm:$0xff]  }
 0x42b   : > { %2804 = vmatprep.subr.bf16.mxu1 %v3191_v19  ;;  %v3199_v29 = vld [vmem:[#allocation8 + $0xe0] sm:$0xff]   ;;  %v3203_v32 = vld [vmem:[#allocation8 + $0xd8] sm:$0xff]   ;;  %v3207_v39 = vld [vmem:[#allocation8 + $0xd0] sm:$0xff]  }
 0x42c   : > { %v3200_v17 = vld [vmem:[#allocation8 + $0x20] sm:$0xff]   ;;  %v3204_v34 = vld [vmem:[#allocation8 + $0x18] sm:$0xff]   ;;  %v3208_v27 = vld [vmem:[#allocation8 + $0x10] sm:$0xff]  }
 0x42d   : > { %2783 = vmatpush3.bf16.msra.mxu0 %v3192_v20  ;;  %v3201_v30 = vld [vmem:[#allocation8 + $0xa0] sm:$0xff]   ;;  %v3205_v35 = vld [vmem:[#allocation8 + $0x98] sm:$0xff]   ;;  %v3209_v40 = vld [vmem:[#allocation8 + $0x90] sm:$0xff]  }
 0x42e   : > { %2805 = vmatpush3.bf16.msra.mxu1 %v3193_v21  ;;  %2784 = vmatprep.subr.bf16.mxu0 %v3194_v22  ;;  %v3210_v42 = vld [vmem:[#allocation8 + $0x48] sm:$0xff]   ;;  %v3214_v16 = vld [vmem:[#allocation8 + $0x40] sm:$0xff]   ;;  %v2041_v50 = vld [vmem:[#allocation2] sm:$0xff] }
 0x42f   : > { %2806 = vmatprep.subr.bf16.mxu1 %v3195_v23  ;;  %v3211_v43 = vld [vmem:[#allocation8 + $0xc8] sm:$0xff]   ;;  %v3215_v33 = vld [vmem:[#allocation8 + $0xc0] sm:$0xff]   ;;  %v2042_v52 = vld [vmem:[#allocation2 + $0x8] sm:$0xff]  ;;  %v2738_v54 = vcombine.low %v2041_v50, %v2041_v50  ;;  %v2739_v55 = vcombine.high %v2041_v50, %v2041_v50 }
 0x430   : > { %v3212_v44 = vld [vmem:[#allocation8 + $0x8] sm:$0xff]   ;;  %v3216_v46 = vld [vmem:[#allocation8] sm:$0xff]   ;;  %v2740_v47 = vcombine.low %v2042_v52, %v2042_v52  ;;  %v2741_v51 = vcombine.high %v2042_v52, %v2042_v52  ;;  %v2737_v58 = vld [vmem:[#allocation12] ss:$0 sm:$0xff] }
 0x431   : > { %2785 = vmatpush3.bf16.msra.mxu0 %v3196_v24  ;;  %v3213_v45 = vld [vmem:[#allocation8 + $0x88] sm:$0xff]   ;;  %v3217_v49 = vld [vmem:[#allocation8 + $0x80] sm:$0xff]   ;;  %2352 = vmatprep.mubr.bf16.mxu0 %v2739_v55 }
 0x432   : > { %2807 = vmatpush3.bf16.msra.mxu1 %v3197_v25  ;;  %2786 = vmatprep.subr.bf16.mxu0 %v3198_v26 }
 0x433   : > { %2808 = vmatprep.subr.bf16.mxu1 %v3199_v29  ;;  %2392 = vmatprep.mubr.bf16.mxu1 %v2741_v51 }
 0x435   : > { %2787 = vmatpush3.bf16.msra.mxu0 %v3200_v17 }
 0x436   : > { %2809 = vmatpush3.bf16.msra.mxu1 %v3201_v30  ;;  %2788 = vmatprep.subr.bf16.mxu0 %v3202_v31 }
 0x437   : > { %2810 = vmatprep.subr.bf16.mxu1 %v3203_v32 }
 0x439   : > { %2789 = vmatpush3.bf16.msra.mxu0 %v3204_v34 }
 0x43a   : > { %2811 = vmatpush3.bf16.msra.mxu1 %v3205_v35  ;;  %2790 = vmatprep.subr.bf16.mxu0 %v3206_v36 }
 0x43b   : > { %2812 = vmatprep.subr.bf16.mxu1 %v3207_v39 }
 0x43d   : > { %2791 = vmatpush3.bf16.msra.mxu0 %v3208_v27 }
 0x43e   : > { %2813 = vmatpush3.bf16.msra.mxu1 %v3209_v40  ;;  %2792 = vmatprep.subr.bf16.mxu0 %v3210_v42 }
 0x43f   : > { %2814 = vmatprep.subr.bf16.mxu1 %v3211_v43 }
 0x441   : > { %2793 = vmatpush3.bf16.msra.mxu0 %v3212_v44 }
 0x442   : > { %2815 = vmatpush3.bf16.msra.mxu1 %v3213_v45  ;;  %2794 = vmatprep.subr.bf16.mxu0 %v3214_v16 }
 0x443   : > { %2816 = vmatprep.subr.bf16.mxu1 %v3215_v33 }
 0x445   : > { %2795 = vmatpush3.bf16.msra.mxu0 %v3216_v46 }
 0x446   : > { %2817 = vmatpush3.bf16.msra.mxu1 %v3217_v49 }
 0x448   : > { %2353 = vmatmul.mubr.bf16.vlgmr.msra.gmra.mxu0 %v2738_v54 }
 0x449   : > { %2393 = vmatmul.mubr.bf16.vlgmr.msra.gmra.mxu1 %v2740_v47 }
 0x508   : > { %v2796_v48 = vpop.f32.mrf.mxu0 }
 0x509   : > { %v2818_v57 = vpop.f32.mrf.mxu1 }
 0x50a   : > { %v2797_v41 = vpop.f32.mrf.mxu0 }
 0x50b   : > { %v2819_v59 = vpop.f32.mrf.mxu1  ;;  %v2798_v38 = vadd.f32 %v2797_v41, %v2796_v48 }
 0x50c   : > { %v2799_v60 = vpop.f32.mrf.mxu0  ;;  %v2820_v56 = vadd.f32 %v2819_v59, %v2818_v57 }
 0x50d   : > { %v2821_v53 = vpop.f32.mrf.mxu1  ;;  %v2355_v61 = vadd.f32 %v2798_v38, %v2737_v58 }
 0x50e   : > { %v2800_v62 = vpop.f32.mrf.mxu0 }
 0x50f   : > { %v2822_v63 = vpop.f32.mrf.mxu1  ;;  %v2395_v0 = vadd.f32 %v2820_v56, %v2355_v61 }
 0x511   : > { %2400 = vst [vmem:[#allocation13] sm:$0xff] %v2395_v0 }
 0x512 PF: > { %p2877_p10 = scmp.eq.s32.totalorder %s3564_s30, 2  ;;  %s3494_s27 = smov [#allocation13]  }
 0x513   : > { %s2410_s23 = sshll.u32 %s3494_s27, 4  ;;  %s2411_s23 = int_to_ptr.vmem [resolvable:$true] %s2410_s23 }
 0x514   : > { %s3382_s11 = scalar_lea.vmem %s2411_s23, 128  ;;  %p3389_p9 = scmp.lt.s32.totalorder %s2411_s23, %s2411_s23 }
 0x515   : > { %p3383_p12 = scmp.ne.s32.totalorder %s2411_s23, %s3382_s11  ;;  %p3390_p0 = scmp.lt.s32.totalorder %s3382_s11, %s3382_s11 }
 0x517   : > { %p3384_p11 = pnand %p3383_p12, %p2877_p10  ;;  %p3391_p7 = por %p3390_p0, %p3389_p9 }
 0x519   : > { %p3385_p13 = pneg %p3384_p11 }
 0x51b   : > { %p3392_p2 = pnand %p3391_p7, %p3385_p13 }
 0x51d   : > { %3395 = shalt.err (!%p3392_p2)
}
 0x51e   : > { %2845 = dma.vmem_to_hbm [thread:$0]  (%p2877_p10), %s2411_s23, 128, %s3973_s7, [#allocation5]  }
 0x51f   : > { %3455 = dma.done.wait (%p2877_p10), [#allocation5], 128  }
 0x520   : > { %3457 = vsyncadd (%p2877_p10), [#allocation5], 4294967168 }
 0x521 PF: > { %s23_s29 = sadd.s32 1, %s3480_s29   ;;  %s4007_s20 = smov %s4014_s24 }
 0x522   : > { %p20_p1 = scmp.ge.s32.totalorder %s23_s29, 5   ;;  %s4008_s24 = smov %s3464_s25 }
 0x523   : > { %s4009_s25 = smov %s3468_s26  ;;  %s4010_s26 = smov %s3639_s14 }
 0x524   : > { %s4011_s27 = smov %s3476_s28  ;;  %s4012_s28 = smov %s4007_s20 }
 0x525   :  { %22 = sbr.rel (!%p20_p1) target bundleno = 13 (0xd), region = 127 }
 0x52a   :  { %2423 = vsyncpa [#allocation4], 1 }
 0x52b   :  { %2425 = vsyncpa [#allocation4 + $0x1], 1 }
 0x52c   :  { %2426 = vsyncpa [#allocation7], 1 }
 0x52d   :  { %2428 = vsyncpa [#allocation7 + $0x1], 1 }
 0x52e   :  { %2429 = vsyncpa [#allocation10], 1 }
 0x52f   :  { %2430 = vsyncpa [#allocation5], 1 }
 0x530   :  { %2432 = vsyncpa [#allocation5 + $0x1], 1 }

</bundles_post_ra>
